<compile_context>
chip_gen: v5e
topology: v5e:2x2
jax: 0.10.0
libtpu: 0.0.40
codegen_flags: <defaults>
</compile_context>

<pallas_src>
import math
import jax
import jax.numpy as jnp
from jax import lax
from jax.experimental import pallas as pl
from jax.experimental.pallas import tpu as pltpu


# ---------------------------------------------------------------------------
# In-kernel helpers
# ---------------------------------------------------------------------------
def _layer_norm(x, g, b, eps=1e-5):
    # Single pass: E[x] and E[x^2] together; biased variance (matches PyTorch LayerNorm).
    mu = jnp.mean(x, axis=-1, keepdims=True)
    ex2 = jnp.mean(x * x, axis=-1, keepdims=True)
    var = jnp.maximum(ex2 - mu * mu, 0.0)
    return (x - mu) * lax.rsqrt(var + eps) * g + b


def _erf(x):
    # Abramowitz & Stegun 7.1.26 rational approximation (|err| < 1.5e-7).
    a1, a2, a3, a4, a5 = 0.254829592, -0.284496736, 1.421413741, -1.453152027, 1.061405429
    p = 0.3275911
    sgn = jnp.where(x >= 0.0, 1.0, -1.0)
    ax = jnp.abs(x)
    t = pl.reciprocal(1.0 + p * ax, approx=True)          # EUP slot instead of VPU divide
    poly = ((((a5 * t + a4) * t + a3) * t + a2) * t + a1) * t
    return sgn * (1.0 - poly * jnp.exp(-ax * ax))


def _gelu_exact(x):
    # nn.GELU() default (erf-based); kept exact-form for numerics vs the PyTorch module.
    return 0.5 * x * (1.0 + _erf(x * (1.0 / math.sqrt(2.0))))


# ---------------------------------------------------------------------------
# Fused transformer kernel: grid = (batch_blocks, n_layer)
# ---------------------------------------------------------------------------
def make_transformer_kernel(n_head, seq_len, n_embd, block_b):
    C = n_embd
    T = seq_len
    Bb = block_b
    M = Bb * T                        # rows fed to every position-wise matmul
    hd = C // n_head
    G = n_head * Bb                   # fused (head, batch) dim for attention
    bf16 = jnp.bfloat16
    f32 = jnp.float32

    def from_heads(y):                # (G, T, hd) -> (M, C)  (head-major along C, as PyTorch)
        y = y.reshape(n_head, M, hd)
        y = pltpu.einshape("hmd->mhd", y)                 # (M, n_head, hd)
        return y.reshape(M, C)

    def kernel(x_ref,
               w_emb_ref, emb_bias_ref,
               ln1_g_ref, ln1_b_ref,
               w_attn_ref, b_attn_ref,
               w_aproj_ref, b_aproj_ref,
               ln2_g_ref, ln2_b_ref,
               w_fc_ref, b_fc_ref,
               w_mproj_ref, b_mproj_ref,
               lnf_g_ref, lnf_b_ref,
               w_head_ref, out_shift_ref,
               out_ref, h_ref):
        l = pl.program_id(1)
        n_l = pl.num_programs(1)

        # --- embedding: only on the first layer step of this batch block ---
        @pl.when(l == 0)
        def _():
            x2 = x_ref[...].reshape(M, -1).astype(bf16)                     # (M, num_in)
            emb = jnp.dot(x2, w_emb_ref[...], preferred_element_type=f32)   # (M, C) f32
            # folded input affine/bias + positional embedding, broadcast over Bb
            h_ref[...] = (emb.reshape(Bb, T, C) + emb_bias_ref[...]).reshape(M, C)
            # drop(p=0.0) in eval mode -> identity

        h = h_ref[...]                                                      # (M, C) f32

        # additive causal mask bias (tiny: (1, T, T))
        row = lax.broadcasted_iota(jnp.int32, (1, T, T), 1)
        col = lax.broadcasted_iota(jnp.int32, (1, T, T), 2)
        mask_bias = jnp.where(col <= row, 0.0, -1e30).astype(f32)

        # --- causal self-attention (1/sqrt(hd) pre-folded into Q columns of w_attn) ---
        ln1 = _layer_norm(h, ln1_g_ref[...], ln1_b_ref[...])
        qkv = jnp.dot(ln1.astype(bf16), w_attn_ref[...],
                      preferred_element_type=f32) + b_attn_ref[...]         # (M, 3C) f32
        # one head-transpose for q/k/v together; bf16 operands for the MXU
        qkv_h = pltpu.einshape("mhd->hmd", qkv.reshape(M, 3 * n_head, hd))  # (3*n_head, M, hd)
        qkv_h = qkv_h.reshape(3, G, T, hd).astype(bf16)
        qh, kh, vh = qkv_h[0], qkv_h[1], qkv_h[2]                           # (G, T, hd) bf16

        s = jnp.einsum('gqd,gkd->gqk', qh, kh, preferred_element_type=f32)  # (G, T, T) f32
        s = s + mask_bias
        s = s - jnp.max(s, axis=-1, keepdims=True)
        p = jnp.exp(s)
        p = p * pl.reciprocal(jnp.sum(p, axis=-1, keepdims=True), approx=True)
        # TODO(synk): for T >~ 256 switch to a key-tiled online softmax (flash-style) to
        # bound the live (G, T, T) activations in VMEM.
        y = jnp.einsum('gqk,gkd->gqd', p.astype(bf16), vh,
                       preferred_element_type=f32)                          # (G, T, hd) f32
        y = from_heads(y)                                                   # (M, C)

        attn = jnp.dot(y.astype(bf16), w_aproj_ref[...],
                       preferred_element_type=f32) + b_aproj_ref[...]
        h = h + attn

        # --- MLP ---
        ln2 = _layer_norm(h, ln2_g_ref[...], ln2_b_ref[...])
        m = jnp.dot(ln2.astype(bf16), w_fc_ref[...],
                    preferred_element_type=f32) + b_fc_ref[...]
        m = _gelu_exact(m)
        m = jnp.dot(m.astype(bf16), w_mproj_ref[...],
                    preferred_element_type=f32) + b_mproj_ref[...]
        h = h + m
        h_ref[...] = h

        # --- final LN + lm_head on the last timestep: only on the last layer step ---
        @pl.when(l == n_l - 1)
        def _():
            last = h.reshape(Bb, T, C)[:, T - 1, :]                         # (Bb, C)
            hf = _layer_norm(last, lnf_g_ref[...], lnf_b_ref[...])
            out = jnp.dot(hf.astype(bf16), w_head_ref[...],
                          preferred_element_type=f32)                       # (Bb, NP)
            out_ref[:, 0, :] = out + out_shift_ref[...]

    return kernel


# ---------------------------------------------------------------------------
# Wrapper helpers
# ---------------------------------------------------------------------------
def _blockspec(shape, index_map, buffer_count=None):
    if buffer_count is None:
        return pl.BlockSpec(shape, index_map)
    try:
        return pl.BlockSpec(shape, index_map, pipeline_mode=pl.Buffered(buffer_count))
    except (TypeError, AttributeError):
        # pipeline_mode not supported in this pallas version -> fall back to default buffering
        return pl.BlockSpec(shape, index_map)


def _vmem_limit_bytes():
    # ~75% of physical VMEM (v5e/v6e: 128 MiB, v7x: 64 MiB), leaving compiler headroom.
    try:
        cap = int(pltpu.get_tpu_info().vmem_capacity_bytes)
    except Exception:
        cap = 64 * 1024 * 1024
    return int(cap * 3 // 4)


def _pick_block_b(B, T, target_rows=256):
    # Fill the MXU M-dimension while evenly dividing B; keep >= 2 batch-grid steps so the
    # 'parallel' axis can shard across the 2 TensorCores on v7x (no-op on v5e/v6e).
    bb = max(1, min(B, target_rows // max(T, 1)))
    while B % bb:
        bb -= 1
    if B >= 2 and B // bb < 2:
        bb = max(1, bb // 2)
        while B % bb:
            bb -= 1
    return bb


# ---------------------------------------------------------------------------
# Forward wrapper
# ---------------------------------------------------------------------------
def transformer_forward(x, params, *, n_layer, n_head, block_b=None):
    B, T, num_in = x.shape
    C = params['w_emb'].shape[1]
    num_out = params['w_head'].shape[1]
    NP = 128 * pl.cdiv(num_out, 128)          # lane-dense (padded) head output width
    hd = C // n_head

    Bb = block_b if block_b is not None else _pick_block_b(B, T)
    assert B % Bb == 0

    f32, bf16 = jnp.float32, jnp.bfloat16

    # Fold FeatureScaler input affine + embedding bias + positional embedding.
    w_emb_eff = (params['in_scale'].reshape(num_in, 1) * params['w_emb']).astype(bf16)
    emb_bias = (params['in_shift'] @ params['w_emb'] + params['b_emb']
                + params['pos']).astype(f32)                                 # (T, C)

    # Fold 1/sqrt(hd) into the Q columns of c_attn (weight + bias).
    att_scale = 1.0 / math.sqrt(hd)
    qkv_scale = jnp.concatenate([jnp.full((C,), att_scale, f32), jnp.ones((2 * C,), f32)])
    w_attn_eff = (params['w_attn'] * qkv_scale).astype(bf16)
    b_attn_eff = (params['b_attn'] * qkv_scale).astype(f32)

    # Fold output descale into lm_head; zero-pad lanes to NP for lane-dense stores.
    w_head_eff = jnp.pad(params['w_head'] * params['out_scale'],
                         ((0, 0), (0, NP - num_out))).astype(bf16)
    out_shift = jnp.pad(params['out_shift'], ((0, 0), (0, NP - num_out))).astype(f32)

    # (array, per_layer?) in kernel-argument order.
    weights = [
        (w_emb_eff, False), (emb_bias, False),
        (params['ln1_g'].astype(f32), True), (params['ln1_b'].astype(f32), True),
        (w_attn_eff, True), (b_attn_eff, True),
        (params['w_aproj'].astype(bf16), True), (params['b_aproj'].astype(f32), True),
        (params['ln2_g'].astype(f32), True), (params['ln2_b'].astype(f32), True),
        (params['w_fc'].astype(bf16), True), (params['b_fc'].astype(f32), True),
        (params['w_mproj'].astype(bf16), True), (params['b_mproj'].astype(f32), True),
        (params['lnf_g'].astype(f32), False), (params['lnf_b'].astype(f32), False),
        (w_head_eff, False), (out_shift, False),
    ]

    in_specs = [_blockspec((Bb, T, num_in), lambda b, l: (b, 0, 0))]
    args = [x]
    for a, per_layer in weights:
        args.append(a)
        if per_layer:
            # stream one layer slab per grid step; default 2-deep buffering prefetches l+1
            in_specs.append(_blockspec((None,) + a.shape[1:], lambda b, l: (l, 0, 0)))
        else:
            # grid-constant weights: single-buffer (halves resident VMEM footprint)
            nd = a.ndim
            in_specs.append(_blockspec(a.shape, lambda b, l, _nd=nd: (0,) * _nd,
                                       buffer_count=1))

    out_spec = pl.BlockSpec((Bb, 1, NP), lambda b, l: (b, 0, 0))

    kernel = make_transformer_kernel(n_head, T, C, Bb)
    out3 = pl.pallas_call(
        kernel,
        out_shape=jax.ShapeDtypeStruct((B, 1, NP), jnp.float32),
        grid=(B // Bb, n_layer),
        in_specs=in_specs,
        out_specs=out_spec,
        scratch_shapes=[pltpu.VMEM((Bb * T, C), jnp.float32)],   # residual stream carry
        compiler_params=pltpu.CompilerParams(
            dimension_semantics=("parallel", "arbitrary"),
            vmem_limit_bytes=_vmem_limit_bytes()),
    )(*args)
    return out3[:, 0, :num_out]     # == descale(lm_head(ln_f(x))[:, -1, :])


# ---------------------------------------------------------------------------
# Deterministic parameter init (mirrors Transformer._init_weights)
# ---------------------------------------------------------------------------
def init_params(key, *, num_inputs, num_outputs, n_layer, n_head, n_embd, seq_len):
    C = n_embd
    std = 0.02
    proj_std = 0.02 / math.sqrt(2 * n_layer)
    ks = jax.random.split(key, 8)

    def normal(k, shape, s=std):
        return (s * jax.random.normal(k, shape)).astype(jnp.float32)

    return dict(
        # TODO(synk): FeatureScaler definition not provided; modeled as a per-feature affine
        # (identity here: scale=1, shift=0).
        in_scale=jnp.ones((1, num_inputs), jnp.float32),
        in_shift=jnp.zeros((1, num_inputs), jnp.float32),
        # state_embedding + pos_embedding
        w_emb=normal(ks[0], (num_inputs, C)),
        b_emb=jnp.zeros((1, C), jnp.float32),
        pos=normal(ks[1], (seq_len, C)),
        # per-layer decoder-block weights, stacked on a leading layer dim
        ln1_g=jnp.ones((n_layer, 1, C), jnp.float32),
        ln1_b=jnp.zeros((n_layer, 1, C), jnp.float32),
        w_attn=normal(ks[2], (n_layer, C, 3 * C)),
        b_attn=jnp.zeros((n_layer, 1, 3 * C), jnp.float32),
        w_aproj=normal(ks[3], (n_layer, C, C), proj_std),
        b_aproj=jnp.zeros((n_layer, 1, C), jnp.float32),
        ln2_g=jnp.ones((n_layer, 1, C), jnp.float32),
        ln2_b=jnp.zeros((n_layer, 1, C), jnp.float32),
        w_fc=normal(ks[4], (n_layer, C, 4 * C)),
        b_fc=jnp.zeros((n_layer, 1, 4 * C), jnp.float32),
        w_mproj=normal(ks[5], (n_layer, 4 * C, C), proj_std),
        b_mproj=jnp.zeros((n_layer, 1, C), jnp.float32),
        # final LN + lm_head (no bias)
        lnf_g=jnp.ones((1, C), jnp.float32),
        lnf_b=jnp.zeros((1, C), jnp.float32),
        w_head=normal(ks[6], (C, num_outputs)),
        out_scale=jnp.ones((1, num_outputs), jnp.float32),
        out_shift=jnp.zeros((1, num_outputs), jnp.float32),
    )


# ---------------------------------------------------------------------------
# Pure-JAX f32 reference (for correctness check)
# ---------------------------------------------------------------------------
def reference_forward(x, params, *, n_layer, n_head):
    B, T, _ = x.shape
    C = params['w_emb'].shape[1]
    hd = C // n_head

    def ln(z, g, b, eps=1e-5):
        mu = z.mean(-1, keepdims=True)
        var = ((z - mu) ** 2).mean(-1, keepdims=True)
        return (z - mu) / jnp.sqrt(var + eps) * g + b

    xs = x * params['in_scale'][0] + params['in_shift'][0]
    h = xs @ params['w_emb'] + params['b_emb'][0] + params['pos']
    mask = jnp.tril(jnp.ones((T, T), bool))
    for l in range(n_layer):
        a = ln(h, params['ln1_g'][l, 0], params['ln1_b'][l, 0])
        qkv = a @ params['w_attn'][l] + params['b_attn'][l, 0]
        q, k, v = jnp.split(qkv, 3, axis=-1)
        q = q.reshape(B, T, n_head, hd).transpose(0, 2, 1, 3)
        k = k.reshape(B, T, n_head, hd).transpose(0, 2, 1, 3)
        v = v.reshape(B, T, n_head, hd).transpose(0, 2, 1, 3)
        s = (q @ jnp.swapaxes(k, -1, -2)) / math.sqrt(hd)
        s = jnp.where(mask, s, -jnp.inf)
        p = jax.nn.softmax(s, axis=-1)
        y = (p @ v).transpose(0, 2, 1, 3).reshape(B, T, C)
        h = h + y @ params['w_aproj'][l] + params['b_aproj'][l, 0]

        m = ln(h, params['ln2_g'][l, 0], params['ln2_b'][l, 0])
        m = m @ params['w_fc'][l] + params['b_fc'][l, 0]
        m = jax.nn.gelu(m, approximate=False)
        m = m @ params['w_mproj'][l] + params['b_mproj'][l, 0]
        h = h + m
    hf = ln(h, params['lnf_g'][0], params['lnf_b'][0])
    out = hf[:, -1, :] @ params['w_head']
    return out * params['out_scale'][0] + params['out_shift'][0]


# ---------------------------------------------------------------------------
if __name__ == "__main__":
    # Small config consistent with TransformerConfig defaults (n_head=4, n_embd=32,
    # bias=True, dropout=0.0); n_layer=2 to exercise the layer-streaming grid axis.
    B, T = 2, 8
    num_inputs, num_outputs = 4, 2
    n_layer, n_head, n_embd = 2, 4, 32

    key = jax.random.PRNGKey(0)
    kx, kp = jax.random.split(key)
    x = jax.random.normal(kx, (B, T, num_inputs), dtype=jnp.float32)
    params = init_params(kp, num_inputs=num_inputs, num_outputs=num_outputs,
                         n_layer=n_layer, n_head=n_head, n_embd=n_embd, seq_len=T)

    out = transformer_forward(x, params, n_layer=n_layer, n_head=n_head)
    out = jax.block_until_ready(out)

    ref = reference_forward(x, params, n_layer=n_layer, n_head=n_head)
    assert out.shape == (B, num_outputs), out.shape
    # bf16 weights/activations in all matmuls + approx reciprocals -> relaxed tolerance.
    assert jnp.allclose(out, ref, atol=2e-2, rtol=2e-2), (out, ref)

    print("KERNEL_OK")
</pallas_src>

<mosaic_0001>
module attributes {stable_mosaic.version = 11 : i64} {
  func.func @kernel(%arg0: i32, %arg1: i32, %arg2: memref<1x8x4xf32, #tpu.memory_space<vmem>>, %arg3: memref<4x32xbf16, #tpu.memory_space<vmem>>, %arg4: memref<8x32xf32, #tpu.memory_space<vmem>>, %arg5: memref<1x1x32xf32, #tpu.memory_space<vmem>>, %arg6: memref<1x1x32xf32, #tpu.memory_space<vmem>>, %arg7: memref<1x32x96xbf16, #tpu.memory_space<vmem>>, %arg8: memref<1x1x96xf32, #tpu.memory_space<vmem>>, %arg9: memref<1x32x32xbf16, #tpu.memory_space<vmem>>, %arg10: memref<1x1x32xf32, #tpu.memory_space<vmem>>, %arg11: memref<1x1x32xf32, #tpu.memory_space<vmem>>, %arg12: memref<1x1x32xf32, #tpu.memory_space<vmem>>, %arg13: memref<1x32x128xbf16, #tpu.memory_space<vmem>>, %arg14: memref<1x1x128xf32, #tpu.memory_space<vmem>>, %arg15: memref<1x128x32xbf16, #tpu.memory_space<vmem>>, %arg16: memref<1x1x32xf32, #tpu.memory_space<vmem>>, %arg17: memref<1x32xf32, #tpu.memory_space<vmem>>, %arg18: memref<1x32xf32, #tpu.memory_space<vmem>>, %arg19: memref<32x128xbf16, #tpu.memory_space<vmem>>, %arg20: memref<1x128xf32, #tpu.memory_space<vmem>>, %arg21: memref<1x1x128xf32, #tpu.memory_space<vmem>>, %arg22: memref<8x32xf32, #tpu.memory_space<vmem>>) attributes {dimension_semantics = [#tpu.dimension_semantics<parallel>, #tpu.dimension_semantics<arbitrary>], iteration_bounds = array<i64: 2, 2>, scalar_prefetch = 0 : i64, scratch_operands = 1 : i64, tpu.core_type = #tpu.core_type<tc>, window_params = [{transform_indices = @transform_0, window_bounds = array<i64: 1, 8, 4>}, {pipeline_mode = #tpu.pipeline_mode<synchronous>, transform_indices = @transform_1, window_bounds = array<i64: 4, 32>}, {pipeline_mode = #tpu.pipeline_mode<synchronous>, transform_indices = @transform_2, window_bounds = array<i64: 8, 32>}, {transform_indices = @transform_3, window_bounds = array<i64: 1, 1, 32>}, {transform_indices = @transform_4, window_bounds = array<i64: 1, 1, 32>}, {transform_indices = @transform_5, window_bounds = array<i64: 1, 32, 96>}, {transform_indices = @transform_6, window_bounds = array<i64: 1, 1, 96>}, {transform_indices = @transform_7, window_bounds = array<i64: 1, 32, 32>}, {transform_indices = @transform_8, window_bounds = array<i64: 1, 1, 32>}, {transform_indices = @transform_9, window_bounds = array<i64: 1, 1, 32>}, {transform_indices = @transform_10, window_bounds = array<i64: 1, 1, 32>}, {transform_indices = @transform_11, window_bounds = array<i64: 1, 32, 128>}, {transform_indices = @transform_12, window_bounds = array<i64: 1, 1, 128>}, {transform_indices = @transform_13, window_bounds = array<i64: 1, 128, 32>}, {transform_indices = @transform_14, window_bounds = array<i64: 1, 1, 32>}, {pipeline_mode = #tpu.pipeline_mode<synchronous>, transform_indices = @transform_15, window_bounds = array<i64: 1, 32>}, {pipeline_mode = #tpu.pipeline_mode<synchronous>, transform_indices = @transform_16, window_bounds = array<i64: 1, 32>}, {pipeline_mode = #tpu.pipeline_mode<synchronous>, transform_indices = @transform_17, window_bounds = array<i64: 32, 128>}, {pipeline_mode = #tpu.pipeline_mode<synchronous>, transform_indices = @transform_18, window_bounds = array<i64: 1, 128>}, {transform_indices = @transform_19, window_bounds = array<i64: 1, 1, 128>}]} {
    %c0_i32 = arith.constant 0 : i32
    %0 = arith.cmpi eq, %arg1, %c0_i32 : i32
    %1 = arith.extui %0 : i1 to i32
    %c0_i32_0 = arith.constant 0 : i32
    %2 = arith.cmpi ne, %1, %c0_i32_0 : i32
    scf.if %2 {
      %c0_77 = arith.constant 0 : index
      %c0_78 = arith.constant 0 : index
      %c0_79 = arith.constant 0 : index
      %171 = vector.load %arg2[%c0_77, %c0_78, %c0_79] : memref<1x8x4xf32, #tpu.memory_space<vmem>>, vector<1x8x4xf32>
      %172 = vector.shape_cast %171 : vector<1x8x4xf32> to vector<8x4xf32>
      %173 = arith.truncf %172 : vector<8x4xf32> to vector<8x4xbf16>
      %c0_80 = arith.constant 0 : index
      %c0_81 = arith.constant 0 : index
      %174 = vector.load %arg3[%c0_80, %c0_81] : memref<4x32xbf16, #tpu.memory_space<vmem>>, vector<4x32xbf16>
      %cst_82 = arith.constant dense<0.000000e+00> : vector<8x32xf32>
      %175 = tpu.matmul %173, %174, %cst_82 {dimension_numbers = #tpu.dot_dimension_numbers<[1], [0], [0], [1], [0, 0, 1, 1], [], []>} : vector<8x4xbf16>, vector<4x32xbf16>, vector<8x32xf32> -> vector<8x32xf32>
      %176 = vector.shape_cast %175 : vector<8x32xf32> to vector<1x8x32xf32>
      %c0_83 = arith.constant 0 : index
      %c0_84 = arith.constant 0 : index
      %177 = vector.load %arg4[%c0_83, %c0_84] : memref<8x32xf32, #tpu.memory_space<vmem>>, vector<8x32xf32>
      %178 = vector.shape_cast %177 : vector<8x32xf32> to vector<1x8x32xf32>
      %179 = arith.addf %176, %178 : vector<1x8x32xf32>
      %180 = vector.shape_cast %179 : vector<1x8x32xf32> to vector<8x32xf32>
      %c0_85 = arith.constant 0 : index
      %c0_86 = arith.constant 0 : index
      %181 = vector.load %arg22[%c0_85, %c0_86] : memref<8x32xf32, #tpu.memory_space<vmem>>, vector<8x32xf32>
      tpu.vector_store %arg22[%c0_85, %c0_86], %180 {strides = array<i32>} : memref<8x32xf32, #tpu.memory_space<vmem>>, vector<8x32xf32>,
    } else {
    }
    %c0 = arith.constant 0 : index
    %c0_1 = arith.constant 0 : index
    %3 = vector.load %arg22[%c0, %c0_1] : memref<8x32xf32, #tpu.memory_space<vmem>>, vector<8x32xf32>
    %4 = tpu.iota {dimensions = array<i32: 1>} : vector<1x8x8xi32>
    %5 = tpu.iota {dimensions = array<i32: 2>} : vector<1x8x8xi32>
    %6 = arith.cmpi sle, %5, %4 : vector<1x8x8xi32>
    %cst = arith.constant 0.000000e+00 : f32
    %cst_2 = arith.constant -1.000000e+30 : f32
    %7 = vector.broadcast %cst : f32 to vector<1x8x8xf32>
    %8 = vector.broadcast %cst_2 : f32 to vector<1x8x8xf32>
    %9 = arith.select %6, %7, %8 : vector<1x8x8xi1>, vector<1x8x8xf32>
    %c0_3 = arith.constant 0 : index
    %c0_4 = arith.constant 0 : index
    %c0_5 = arith.constant 0 : index
    %10 = vector.load %arg5[%c0_3, %c0_4, %c0_5] : memref<1x1x32xf32, #tpu.memory_space<vmem>>, vector<1x1x32xf32>
    %11 = vector.shape_cast %10 : vector<1x1x32xf32> to vector<1x32xf32>
    %c0_6 = arith.constant 0 : index
    %c0_7 = arith.constant 0 : index
    %c0_8 = arith.constant 0 : index
    %12 = vector.load %arg6[%c0_6, %c0_7, %c0_8] : memref<1x1x32xf32, #tpu.memory_space<vmem>>, vector<1x1x32xf32>
    %13 = vector.shape_cast %12 : vector<1x1x32xf32> to vector<1x32xf32>
    %cst_9 = arith.constant dense<0.000000e+00> : vector<8xf32>
    %14 = vector.multi_reduction <add>, %3, %cst_9 [1] : vector<8x32xf32> to vector<8xf32>
    %15 = vector.shape_cast %14 : vector<8xf32> to vector<8x1xf32>
    %cst_10 = arith.constant 3.200000e+01 : f32
    %16 = vector.broadcast %cst_10 : f32 to vector<8x1xf32>
    %17 = arith.divf %15, %16 : vector<8x1xf32>
    %18 = arith.mulf %3, %3 : vector<8x32xf32>
    %cst_11 = arith.constant dense<0.000000e+00> : vector<8xf32>
    %19 = vector.multi_reduction <add>, %18, %cst_11 [1] : vector<8x32xf32> to vector<8xf32>
    %20 = vector.shape_cast %19 : vector<8xf32> to vector<8x1xf32>
    %cst_12 = arith.constant 3.200000e+01 : f32
    %21 = vector.broadcast %cst_12 : f32 to vector<8x1xf32>
    %22 = arith.divf %20, %21 : vector<8x1xf32>
    %23 = arith.mulf %17, %17 : vector<8x1xf32>
    %24 = arith.subf %22, %23 : vector<8x1xf32>
    %cst_13 = arith.constant 0.000000e+00 : f32
    %25 = vector.broadcast %cst_13 : f32 to vector<8x1xf32>
    %26 = arith.maximumf %24, %25 : vector<8x1xf32>
    %27 = vector.broadcast %17 : vector<8x1xf32> to vector<8x32xf32>
    %28 = arith.subf %3, %27 : vector<8x32xf32>
    %cst_14 = arith.constant 9.99999974E-6 : f32
    %29 = vector.broadcast %cst_14 : f32 to vector<8x1xf32>
    %30 = arith.addf %26, %29 : vector<8x1xf32>
    %31 = math.rsqrt %30 : vector<8x1xf32>
    %32 = vector.broadcast %31 : vector<8x1xf32> to vector<8x32xf32>
    %33 = arith.mulf %28, %32 : vector<8x32xf32>
    %34 = vector.broadcast %11 : vector<1x32xf32> to vector<8x32xf32>
    %35 = arith.mulf %33, %34 : vector<8x32xf32>
    %36 = vector.broadcast %13 : vector<1x32xf32> to vector<8x32xf32>
    %37 = arith.addf %35, %36 : vector<8x32xf32>
    %38 = arith.truncf %37 : vector<8x32xf32> to vector<8x32xbf16>
    %c0_15 = arith.constant 0 : index
    %c0_16 = arith.constant 0 : index
    %c0_17 = arith.constant 0 : index
    %39 = vector.load %arg7[%c0_15, %c0_16, %c0_17] : memref<1x32x96xbf16, #tpu.memory_space<vmem>>, vector<1x32x96xbf16>
    %40 = vector.shape_cast %39 : vector<1x32x96xbf16> to vector<32x96xbf16>
    %cst_18 = arith.constant dense<0.000000e+00> : vector<8x96xf32>
    %41 = tpu.matmul %38, %40, %cst_18 {dimension_numbers = #tpu.dot_dimension_numbers<[1], [0], [0], [1], [0, 0, 1, 1], [], []>} : vector<8x32xbf16>, vector<32x96xbf16>, vector<8x96xf32> -> vector<8x96xf32>
    %c0_19 = arith.constant 0 : index
    %c0_20 = arith.constant 0 : index
    %c0_21 = arith.constant 0 : index
    %42 = vector.load %arg8[%c0_19, %c0_20, %c0_21] : memref<1x1x96xf32, #tpu.memory_space<vmem>>, vector<1x1x96xf32>
    %43 = vector.shape_cast %42 : vector<1x1x96xf32> to vector<1x96xf32>
    %44 = vector.broadcast %43 : vector<1x96xf32> to vector<8x96xf32>
    %45 = arith.addf %41, %44 : vector<8x96xf32>
    %46 = vector.shape_cast %45 : vector<8x96xf32> to vector<8x12x8xf32>
    %47 = tpu.transpose %46, [1, 0, 2] : vector<8x12x8xf32> -> vector<12x8x8xf32>
    %48 = vector.shape_cast %47 : vector<12x8x8xf32> to vector<3x4x8x8xf32>
    %49 = arith.truncf %48 : vector<3x4x8x8xf32> to vector<3x4x8x8xbf16>
    %50 = vector.extract_strided_slice %49 {offsets = [0, 0, 0, 0], sizes = [1, 4, 8, 8], strides = [1, 1, 1, 1]} : vector<3x4x8x8xbf16> to vector<1x4x8x8xbf16>
    %51 = vector.shape_cast %50 : vector<1x4x8x8xbf16> to vector<4x8x8xbf16>
    %52 = vector.extract_strided_slice %49 {offsets = [1, 0, 0, 0], sizes = [1, 4, 8, 8], strides = [1, 1, 1, 1]} : vector<3x4x8x8xbf16> to vector<1x4x8x8xbf16>
    %53 = vector.shape_cast %52 : vector<1x4x8x8xbf16> to vector<4x8x8xbf16>
    %54 = vector.extract_strided_slice %49 {offsets = [2, 0, 0, 0], sizes = [1, 4, 8, 8], strides = [1, 1, 1, 1]} : vector<3x4x8x8xbf16> to vector<1x4x8x8xbf16>
    %55 = vector.shape_cast %54 : vector<1x4x8x8xbf16> to vector<4x8x8xbf16>
    "tpu.trace_start"() <{level = 10 : i32, message = "gqd,gkd->gqk"}> : () -> ()
    %cst_22 = arith.constant dense<0.000000e+00> : vector<4x8x8xf32>
    %56 = tpu.matmul %51, %53, %cst_22 {dimension_numbers = #tpu.dot_dimension_numbers<[2], [2], [1], [1], [0, 0, 0, 1, 1, 1], [0], [0]>} : vector<4x8x8xbf16>, vector<4x8x8xbf16>, vector<4x8x8xf32> -> vector<4x8x8xf32>
    "tpu.trace_stop"() : () -> ()
    %57 = vector.broadcast %9 : vector<1x8x8xf32> to vector<4x8x8xf32>
    %58 = arith.addf %56, %57 : vector<4x8x8xf32>
    %cst_23 = arith.constant dense<0xFF800000> : vector<4x8xf32>
    %59 = vector.multi_reduction <maximumf>, %58, %cst_23 [2] : vector<4x8x8xf32> to vector<4x8xf32>
    %60 = vector.shape_cast %59 : vector<4x8xf32> to vector<4x8x1xf32>
    %61 = vector.broadcast %60 : vector<4x8x1xf32> to vector<4x8x8xf32>
    %62 = arith.subf %58, %61 : vector<4x8x8xf32>
    %63 = math.exp %62 : vector<4x8x8xf32>
    %cst_24 = arith.constant dense<0.000000e+00> : vector<4x8xf32>
    %64 = vector.multi_reduction <add>, %63, %cst_24 [2] : vector<4x8x8xf32> to vector<4x8xf32>
    %65 = vector.shape_cast %64 : vector<4x8xf32> to vector<4x8x1xf32>
    %66 = tpu.reciprocal %65 {approx = true} : vector<4x8x1xf32> -> vector<4x8x1xf32>
    %67 = vector.broadcast %66 : vector<4x8x1xf32> to vector<4x8x8xf32>
    %68 = arith.mulf %63, %67 : vector<4x8x8xf32>
    %69 = arith.truncf %68 : vector<4x8x8xf32> to vector<4x8x8xbf16>
    "tpu.trace_start"() <{level = 10 : i32, message = "gqk,gkd->gqd"}> : () -> ()
    %cst_25 = arith.constant dense<0.000000e+00> : vector<4x8x8xf32>
    %70 = tpu.matmul %69, %55, %cst_25 {dimension_numbers = #tpu.dot_dimension_numbers<[2], [1], [1], [2], [0, 0, 0, 1, 1, 2], [0], [0]>} : vector<4x8x8xbf16>, vector<4x8x8xbf16>, vector<4x8x8xf32> -> vector<4x8x8xf32>
    "tpu.trace_stop"() : () -> ()
    %71 = tpu.transpose %70, [1, 0, 2] : vector<4x8x8xf32> -> vector<8x4x8xf32>
    %72 = vector.shape_cast %71 : vector<8x4x8xf32> to vector<8x32xf32>
    %73 = arith.truncf %72 : vector<8x32xf32> to vector<8x32xbf16>
    %c0_26 = arith.constant 0 : index
    %c0_27 = arith.constant 0 : index
    %c0_28 = arith.constant 0 : index
    %74 = vector.load %arg9[%c0_26, %c0_27, %c0_28] : memref<1x32x32xbf16, #tpu.memory_space<vmem>>, vector<1x32x32xbf16>
    %75 = vector.shape_cast %74 : vector<1x32x32xbf16> to vector<32x32xbf16>
    %cst_29 = arith.constant dense<0.000000e+00> : vector<8x32xf32>
    %76 = tpu.matmul %73, %75, %cst_29 {dimension_numbers = #tpu.dot_dimension_numbers<[1], [0], [0], [1], [0, 0, 1, 1], [], []>} : vector<8x32xbf16>, vector<32x32xbf16>, vector<8x32xf32> -> vector<8x32xf32>
    %c0_30 = arith.constant 0 : index
    %c0_31 = arith.constant 0 : index
    %c0_32 = arith.constant 0 : index
    %77 = vector.load %arg10[%c0_30, %c0_31, %c0_32] : memref<1x1x32xf32, #tpu.memory_space<vmem>>, vector<1x1x32xf32>
    %78 = vector.shape_cast %77 : vector<1x1x32xf32> to vector<1x32xf32>
    %79 = vector.broadcast %78 : vector<1x32xf32> to vector<8x32xf32>
    %80 = arith.addf %76, %79 : vector<8x32xf32>
    %81 = arith.addf %3, %80 : vector<8x32xf32>
    %c0_33 = arith.constant 0 : index
    %c0_34 = arith.constant 0 : index
    %c0_35 = arith.constant 0 : index
    %82 = vector.load %arg11[%c0_33, %c0_34, %c0_35] : memref<1x1x32xf32, #tpu.memory_space<vmem>>, vector<1x1x32xf32>
    %83 = vector.shape_cast %82 : vector<1x1x32xf32> to vector<1x32xf32>
    %c0_36 = arith.constant 0 : index
    %c0_37 = arith.constant 0 : index
    %c0_38 = arith.constant 0 : index
    %84 = vector.load %arg12[%c0_36, %c0_37, %c0_38] : memref<1x1x32xf32, #tpu.memory_space<vmem>>, vector<1x1x32xf32>
    %85 = vector.shape_cast %84 : vector<1x1x32xf32> to vector<1x32xf32>
    %cst_39 = arith.constant dense<0.000000e+00> : vector<8xf32>
    %86 = vector.multi_reduction <add>, %81, %cst_39 [1] : vector<8x32xf32> to vector<8xf32>
    %87 = vector.shape_cast %86 : vector<8xf32> to vector<8x1xf32>
    %cst_40 = arith.constant 3.200000e+01 : f32
    %88 = vector.broadcast %cst_40 : f32 to vector<8x1xf32>
    %89 = arith.divf %87, %88 : vector<8x1xf32>
    %90 = arith.mulf %81, %81 : vector<8x32xf32>
    %cst_41 = arith.constant dense<0.000000e+00> : vector<8xf32>
    %91 = vector.multi_reduction <add>, %90, %cst_41 [1] : vector<8x32xf32> to vector<8xf32>
    %92 = vector.shape_cast %91 : vector<8xf32> to vector<8x1xf32>
    %cst_42 = arith.constant 3.200000e+01 : f32
    %93 = vector.broadcast %cst_42 : f32 to vector<8x1xf32>
    %94 = arith.divf %92, %93 : vector<8x1xf32>
    %95 = arith.mulf %89, %89 : vector<8x1xf32>
    %96 = arith.subf %94, %95 : vector<8x1xf32>
    %cst_43 = arith.constant 0.000000e+00 : f32
    %97 = vector.broadcast %cst_43 : f32 to vector<8x1xf32>
    %98 = arith.maximumf %96, %97 : vector<8x1xf32>
    %99 = vector.broadcast %89 : vector<8x1xf32> to vector<8x32xf32>
    %100 = arith.subf %81, %99 : vector<8x32xf32>
    %cst_44 = arith.constant 9.99999974E-6 : f32
    %101 = vector.broadcast %cst_44 : f32 to vector<8x1xf32>
    %102 = arith.addf %98, %101 : vector<8x1xf32>
    %103 = math.rsqrt %102 : vector<8x1xf32>
    %104 = vector.broadcast %103 : vector<8x1xf32> to vector<8x32xf32>
    %105 = arith.mulf %100, %104 : vector<8x32xf32>
    %106 = vector.broadcast %83 : vector<1x32xf32> to vector<8x32xf32>
    %107 = arith.mulf %105, %106 : vector<8x32xf32>
    %108 = vector.broadcast %85 : vector<1x32xf32> to vector<8x32xf32>
    %109 = arith.addf %107, %108 : vector<8x32xf32>
    %110 = arith.truncf %109 : vector<8x32xf32> to vector<8x32xbf16>
    %c0_45 = arith.constant 0 : index
    %c0_46 = arith.constant 0 : index
    %c0_47 = arith.constant 0 : index
    %111 = vector.load %arg13[%c0_45, %c0_46, %c0_47] : memref<1x32x128xbf16, #tpu.memory_space<vmem>>, vector<1x32x128xbf16>
    %112 = vector.shape_cast %111 : vector<1x32x128xbf16> to vector<32x128xbf16>
    %cst_48 = arith.constant dense<0.000000e+00> : vector<8x128xf32>
    %113 = tpu.matmul %110, %112, %cst_48 {dimension_numbers = #tpu.dot_dimension_numbers<[1], [0], [0], [1], [0, 0, 1, 1], [], []>} : vector<8x32xbf16>, vector<32x128xbf16>, vector<8x128xf32> -> vector<8x128xf32>
    %c0_49 = arith.constant 0 : index
    %c0_50 = arith.constant 0 : index
    %c0_51 = arith.constant 0 : index
    %114 = vector.load %arg14[%c0_49, %c0_50, %c0_51] : memref<1x1x128xf32, #tpu.memory_space<vmem>>, vector<1x1x128xf32>
    %115 = vector.shape_cast %114 : vector<1x1x128xf32> to vector<1x128xf32>
    %116 = vector.broadcast %115 : vector<1x128xf32> to vector<8x128xf32>
    %117 = arith.addf %113, %116 : vector<8x128xf32>
    %cst_52 = arith.constant 5.000000e-01 : f32
    %118 = vector.broadcast %cst_52 : f32 to vector<8x128xf32>
    %119 = arith.mulf %118, %117 : vector<8x128xf32>
    %cst_53 = arith.constant 0.707106769 : f32
    %120 = vector.broadcast %cst_53 : f32 to vector<8x128xf32>
    %121 = arith.mulf %117, %120 : vector<8x128xf32>
    %cst_54 = arith.constant 0.000000e+00 : f32
    %122 = vector.broadcast %cst_54 : f32 to vector<8x128xf32>
    %123 = arith.cmpf oge, %121, %122 : vector<8x128xf32>
    %cst_55 = arith.constant 1.000000e+00 : f32
    %cst_56 = arith.constant -1.000000e+00 : f32
    %124 = vector.broadcast %cst_55 : f32 to vector<8x128xf32>
    %125 = vector.broadcast %cst_56 : f32 to vector<8x128xf32>
    %126 = arith.select %123, %124, %125 : vector<8x128xi1>, vector<8x128xf32>
    %127 = math.absf %121 : vector<8x128xf32>
    %cst_57 = arith.constant 0.327591091 : f32
    %128 = vector.broadcast %cst_57 : f32 to vector<8x128xf32>
    %129 = arith.mulf %128, %127 : vector<8x128xf32>
    %cst_58 = arith.constant 1.000000e+00 : f32
    %130 = vector.broadcast %cst_58 : f32 to vector<8x128xf32>
    %131 = arith.addf %130, %129 : vector<8x128xf32>
    %132 = tpu.reciprocal %131 {approx = true} : vector<8x128xf32> -> vector<8x128xf32>
    %cst_59 = arith.constant 1.06140542 : f32
    %133 = vector.broadcast %cst_59 : f32 to vector<8x128xf32>
    %134 = arith.mulf %133, %132 : vector<8x128xf32>
    %cst_60 = arith.constant -1.45315206 : f32
    %135 = vector.broadcast %cst_60 : f32 to vector<8x128xf32>
    %136 = arith.addf %134, %135 : vector<8x128xf32>
    %137 = arith.mulf %136, %132 : vector<8x128xf32>
    %cst_61 = arith.constant 1.42141378 : f32
    %138 = vector.broadcast %cst_61 : f32 to vector<8x128xf32>
    %139 = arith.addf %137, %138 : vector<8x128xf32>
    %140 = arith.mulf %139, %132 : vector<8x128xf32>
    %cst_62 = arith.constant -0.284496725 : f32
    %141 = vector.broadcast %cst_62 : f32 to vector<8x128xf32>
    %142 = arith.addf %140, %141 : vector<8x128xf32>
    %143 = arith.mulf %142, %132 : vector<8x128xf32>
    %cst_63 = arith.constant 0.254829586 : f32
    %144 = vector.broadcast %cst_63 : f32 to vector<8x128xf32>
    %145 = arith.addf %143, %144 : vector<8x128xf32>
    %146 = arith.mulf %145, %132 : vector<8x128xf32>
    %cst_64 = arith.constant 0.000000e+00 : f32
    %147 = vector.broadcast %cst_64 : f32 to vector<8x128xf32>
    %148 = arith.subf %147, %127 : vector<8x128xf32>
    %149 = arith.mulf %148, %127 : vector<8x128xf32>
    %150 = math.exp %149 : vector<8x128xf32>
    %151 = arith.mulf %146, %150 : vector<8x128xf32>
    %cst_65 = arith.constant 1.000000e+00 : f32
    %152 = vector.broadcast %cst_65 : f32 to vector<8x128xf32>
    %153 = arith.subf %152, %151 : vector<8x128xf32>
    %154 = arith.mulf %126, %153 : vector<8x128xf32>
    %cst_66 = arith.constant 1.000000e+00 : f32
    %155 = vector.broadcast %cst_66 : f32 to vector<8x128xf32>
    %156 = arith.addf %155, %154 : vector<8x128xf32>
    %157 = arith.mulf %119, %156 : vector<8x128xf32>
    %158 = arith.truncf %157 : vector<8x128xf32> to vector<8x128xbf16>
    %c0_67 = arith.constant 0 : index
    %c0_68 = arith.constant 0 : index
    %c0_69 = arith.constant 0 : index
    %159 = vector.load %arg15[%c0_67, %c0_68, %c0_69] : memref<1x128x32xbf16, #tpu.memory_space<vmem>>, vector<1x128x32xbf16>
    %160 = vector.shape_cast %159 : vector<1x128x32xbf16> to vector<128x32xbf16>
    %cst_70 = arith.constant dense<0.000000e+00> : vector<8x32xf32>
    %161 = tpu.matmul %158, %160, %cst_70 {dimension_numbers = #tpu.dot_dimension_numbers<[1], [0], [0], [1], [0, 0, 1, 1], [], []>} : vector<8x128xbf16>, vector<128x32xbf16>, vector<8x32xf32> -> vector<8x32xf32>
    %c0_71 = arith.constant 0 : index
    %c0_72 = arith.constant 0 : index
    %c0_73 = arith.constant 0 : index
    %162 = vector.load %arg16[%c0_71, %c0_72, %c0_73] : memref<1x1x32xf32, #tpu.memory_space<vmem>>, vector<1x1x32xf32>
    %163 = vector.shape_cast %162 : vector<1x1x32xf32> to vector<1x32xf32>
    %164 = vector.broadcast %163 : vector<1x32xf32> to vector<8x32xf32>
    %165 = arith.addf %161, %164 : vector<8x32xf32>
    %166 = arith.addf %81, %165 : vector<8x32xf32>
    %c0_74 = arith.constant 0 : index
    %c0_75 = arith.constant 0 : index
    %167 = vector.load %arg22[%c0_74, %c0_75] : memref<8x32xf32, #tpu.memory_space<vmem>>, vector<8x32xf32>
    tpu.vector_store %arg22[%c0_74, %c0_75], %166 {strides = array<i32>} : memref<8x32xf32, #tpu.memory_space<vmem>>, vector<8x32xf32>,
    %c1_i32 = arith.constant 1 : i32
    %168 = arith.cmpi eq, %arg1, %c1_i32 : i32
    %169 = arith.extui %168 : i1 to i32
    %c0_i32_76 = arith.constant 0 : i32
    %170 = arith.cmpi ne, %169, %c0_i32_76 : i32
    scf.if %170 {
      %171 = vector.shape_cast %166 : vector<8x32xf32> to vector<1x8x32xf32>
      %172 = vector.extract_strided_slice %171 {offsets = [0, 7, 0], sizes = [1, 1, 32], strides = [1, 1, 1]} : vector<1x8x32xf32> to vector<1x1x32xf32>
      %173 = vector.shape_cast %172 : vector<1x1x32xf32> to vector<1x32xf32>
      %c0_77 = arith.constant 0 : index
      %c0_78 = arith.constant 0 : index
      %174 = vector.load %arg17[%c0_77, %c0_78] : memref<1x32xf32, #tpu.memory_space<vmem>>, vector<1x32xf32>
      %c0_79 = arith.constant 0 : index
      %c0_80 = arith.constant 0 : index
      %175 = vector.load %arg18[%c0_79, %c0_80] : memref<1x32xf32, #tpu.memory_space<vmem>>, vector<1x32xf32>
      %cst_81 = arith.constant dense<0.000000e+00> : vector<1xf32>
      %176 = vector.multi_reduction <add>, %173, %cst_81 [1] : vector<1x32xf32> to vector<1xf32>
      %177 = vector.shape_cast %176 : vector<1xf32> to vector<1x1xf32>
      %cst_82 = arith.constant 3.200000e+01 : f32
      %178 = vector.broadcast %cst_82 : f32 to vector<1x1xf32>
      %179 = arith.divf %177, %178 : vector<1x1xf32>
      %180 = arith.mulf %173, %173 : vector<1x32xf32>
      %cst_83 = arith.constant dense<0.000000e+00> : vector<1xf32>
      %181 = vector.multi_reduction <add>, %180, %cst_83 [1] : vector<1x32xf32> to vector<1xf32>
      %182 = vector.shape_cast %181 : vector<1xf32> to vector<1x1xf32>
      %cst_84 = arith.constant 3.200000e+01 : f32
      %183 = vector.broadcast %cst_84 : f32 to vector<1x1xf32>
      %184 = arith.divf %182, %183 : vector<1x1xf32>
      %185 = arith.mulf %179, %179 : vector<1x1xf32>
      %186 = arith.subf %184, %185 : vector<1x1xf32>
      %cst_85 = arith.constant 0.000000e+00 : f32
      %187 = vector.broadcast %cst_85 : f32 to vector<1x1xf32>
      %188 = arith.maximumf %186, %187 : vector<1x1xf32>
      %189 = vector.broadcast %179 : vector<1x1xf32> to vector<1x32xf32>
      %190 = arith.subf %173, %189 : vector<1x32xf32>
      %cst_86 = arith.constant 9.99999974E-6 : f32
      %191 = vector.broadcast %cst_86 : f32 to vector<1x1xf32>
      %192 = arith.addf %188, %191 : vector<1x1xf32>
      %193 = math.rsqrt %192 : vector<1x1xf32>
      %194 = vector.broadcast %193 : vector<1x1xf32> to vector<1x32xf32>
      %195 = arith.mulf %190, %194 : vector<1x32xf32>
      %196 = arith.mulf %195, %174 : vector<1x32xf32>
      %197 = arith.addf %196, %175 : vector<1x32xf32>
      %198 = arith.truncf %197 : vector<1x32xf32> to vector<1x32xbf16>
      %c0_87 = arith.constant 0 : index
      %c0_88 = arith.constant 0 : index
      %199 = vector.load %arg19[%c0_87, %c0_88] : memref<32x128xbf16, #tpu.memory_space<vmem>>, vector<32x128xbf16>
      %cst_89 = arith.constant dense<0.000000e+00> : vector<1x128xf32>
      %200 = tpu.matmul %198, %199, %cst_89 {dimension_numbers = #tpu.dot_dimension_numbers<[1], [0], [0], [1], [0, 0, 1, 1], [], []>} : vector<1x32xbf16>, vector<32x128xbf16>, vector<1x128xf32> -> vector<1x128xf32>
      %c0_90 = arith.constant 0 : index
      %c0_91 = arith.constant 0 : index
      %201 = vector.load %arg20[%c0_90, %c0_91] : memref<1x128xf32, #tpu.memory_space<vmem>>, vector<1x128xf32>
      %202 = arith.addf %200, %201 : vector<1x128xf32>
      %c0_92 = arith.constant 0 : index
      %c0_93 = arith.constant 0 : index
      %c0_94 = arith.constant 0 : index
      %203 = vector.load %arg21[%c0_92, %c0_93, %c0_94] : memref<1x1x128xf32, #tpu.memory_space<vmem>>, vector<1x1x128xf32>
      %204 = vector.shape_cast %203 : vector<1x1x128xf32> to vector<1x128xf32>
      %205 = vector.shape_cast %202 : vector<1x128xf32> to vector<1x1x128xf32>
      tpu.vector_store %arg21[%c0_92, %c0_93, %c0_94], %205 {strides = array<i32>} : memref<1x1x128xf32, #tpu.memory_space<vmem>>, vector<1x1x128xf32>,
    } else {
    }
    return
  }
  func.func @transform_0(%arg0: i32, %arg1: i32) -> (i32, i32, i32) {
    %c0_i32 = arith.constant 0 : i32
    %c0_i32_0 = arith.constant 0 : i32
    %c0_i32_1 = arith.constant 0 : i32
    return %arg0, %c0_i32, %c0_i32_0 : i32, i32, i32
  }
  func.func @transform_1(%arg0: i32, %arg1: i32) -> (i32, i32) {
    %c0_i32 = arith.constant 0 : i32
    %c0_i32_0 = arith.constant 0 : i32
    %c0_i32_1 = arith.constant 0 : i32
    return %c0_i32, %c0_i32_0 : i32, i32
  }
  func.func @transform_2(%arg0: i32, %arg1: i32) -> (i32, i32) {
    %c0_i32 = arith.constant 0 : i32
    %c0_i32_0 = arith.constant 0 : i32
    %c0_i32_1 = arith.constant 0 : i32
    return %c0_i32, %c0_i32_0 : i32, i32
  }
  func.func @transform_3(%arg0: i32, %arg1: i32) -> (i32, i32, i32) {
    %c0_i32 = arith.constant 0 : i32
    %c0_i32_0 = arith.constant 0 : i32
    %c0_i32_1 = arith.constant 0 : i32
    return %arg1, %c0_i32, %c0_i32_0 : i32, i32, i32
  }
  func.func @transform_4(%arg0: i32, %arg1: i32) -> (i32, i32, i32) {
    %c0_i32 = arith.constant 0 : i32
    %c0_i32_0 = arith.constant 0 : i32
    %c0_i32_1 = arith.constant 0 : i32
    return %arg1, %c0_i32, %c0_i32_0 : i32, i32, i32
  }
  func.func @transform_5(%arg0: i32, %arg1: i32) -> (i32, i32, i32) {
    %c0_i32 = arith.constant 0 : i32
    %c0_i32_0 = arith.constant 0 : i32
    %c0_i32_1 = arith.constant 0 : i32
    return %arg1, %c0_i32, %c0_i32_0 : i32, i32, i32
  }
  func.func @transform_6(%arg0: i32, %arg1: i32) -> (i32, i32, i32) {
    %c0_i32 = arith.constant 0 : i32
    %c0_i32_0 = arith.constant 0 : i32
    %c0_i32_1 = arith.constant 0 : i32
    return %arg1, %c0_i32, %c0_i32_0 : i32, i32, i32
  }
  func.func @transform_7(%arg0: i32, %arg1: i32) -> (i32, i32, i32) {
    %c0_i32 = arith.constant 0 : i32
    %c0_i32_0 = arith.constant 0 : i32
    %c0_i32_1 = arith.constant 0 : i32
    return %arg1, %c0_i32, %c0_i32_0 : i32, i32, i32
  }
  func.func @transform_8(%arg0: i32, %arg1: i32) -> (i32, i32, i32) {
    %c0_i32 = arith.constant 0 : i32
    %c0_i32_0 = arith.constant 0 : i32
    %c0_i32_1 = arith.constant 0 : i32
    return %arg1, %c0_i32, %c0_i32_0 : i32, i32, i32
  }
  func.func @transform_9(%arg0: i32, %arg1: i32) -> (i32, i32, i32) {
    %c0_i32 = arith.constant 0 : i32
    %c0_i32_0 = arith.constant 0 : i32
    %c0_i32_1 = arith.constant 0 : i32
    return %arg1, %c0_i32, %c0_i32_0 : i32, i32, i32
  }
  func.func @transform_10(%arg0: i32, %arg1: i32) -> (i32, i32, i32) {
    %c0_i32 = arith.constant 0 : i32
    %c0_i32_0 = arith.constant 0 : i32
    %c0_i32_1 = arith.constant 0 : i32
    return %arg1, %c0_i32, %c0_i32_0 : i32, i32, i32
  }
  func.func @transform_11(%arg0: i32, %arg1: i32) -> (i32, i32, i32) {
    %c0_i32 = arith.constant 0 : i32
    %c0_i32_0 = arith.constant 0 : i32
    %c0_i32_1 = arith.constant 0 : i32
    return %arg1, %c0_i32, %c0_i32_0 : i32, i32, i32
  }
  func.func @transform_12(%arg0: i32, %arg1: i32) -> (i32, i32, i32) {
    %c0_i32 = arith.constant 0 : i32
    %c0_i32_0 = arith.constant 0 : i32
    %c0_i32_1 = arith.constant 0 : i32
    return %arg1, %c0_i32, %c0_i32_0 : i32, i32, i32
  }
  func.func @transform_13(%arg0: i32, %arg1: i32) -> (i32, i32, i32) {
    %c0_i32 = arith.constant 0 : i32
    %c0_i32_0 = arith.constant 0 : i32
    %c0_i32_1 = arith.constant 0 : i32
    return %arg1, %c0_i32, %c0_i32_0 : i32, i32, i32
  }
  func.func @transform_14(%arg0: i32, %arg1: i32) -> (i32, i32, i32) {
    %c0_i32 = arith.constant 0 : i32
    %c0_i32_0 = arith.constant 0 : i32
    %c0_i32_1 = arith.constant 0 : i32
    return %arg1, %c0_i32, %c0_i32_0 : i32, i32, i32
  }
  func.func @transform_15(%arg0: i32, %arg1: i32) -> (i32, i32) {
    %c0_i32 = arith.constant 0 : i32
    %c0_i32_0 = arith.constant 0 : i32
    %c0_i32_1 = arith.constant 0 : i32
    return %c0_i32, %c0_i32_0 : i32, i32
  }
  func.func @transform_16(%arg0: i32, %arg1: i32) -> (i32, i32) {
    %c0_i32 = arith.constant 0 : i32
    %c0_i32_0 = arith.constant 0 : i32
    %c0_i32_1 = arith.constant 0 : i32
    return %c0_i32, %c0_i32_0 : i32, i32
  }
  func.func @transform_17(%arg0: i32, %arg1: i32) -> (i32, i32) {
    %c0_i32 = arith.constant 0 : i32
    %c0_i32_0 = arith.constant 0 : i32
    %c0_i32_1 = arith.constant 0 : i32
    return %c0_i32, %c0_i32_0 : i32, i32
  }
  func.func @transform_18(%arg0: i32, %arg1: i32) -> (i32, i32) {
    %c0_i32 = arith.constant 0 : i32
    %c0_i32_0 = arith.constant 0 : i32
    %c0_i32_1 = arith.constant 0 : i32
    return %c0_i32, %c0_i32_0 : i32, i32
  }
  func.func @transform_19(%arg0: i32, %arg1: i32) -> (i32, i32, i32) {
    %c0_i32 = arith.constant 0 : i32
    %c0_i32_0 = arith.constant 0 : i32
    %c0_i32_1 = arith.constant 0 : i32
    return %arg0, %c0_i32, %c0_i32_0 : i32, i32, i32
  }
}

</mosaic_0001>

<bundles_post_ra>
// kernel: tpu_custom_call.1
= control target key start
LH: loop header
LB: loop body
LE: loop exit
PB: predicated region body
PF: predicated region fallthrough
CT: control target
= control target key end

     0   :  { %s3098_s0 = inlined_call_operand.vmem [shape: f32[2,8,4], index: 0, kind: input, shape index: {}]   ;;  %s3099_s1 = inlined_call_operand.vmem [shape: bf16[4,32], index: 1, kind: input, shape index: {}]   ;;  %s3100_s2 = inlined_call_operand.vmem [shape: f32[8,32], index: 2, kind: input, shape index: {}]   ;;  %s3101_s3 = inlined_call_operand.vmem [shape: f32[2,1,32], index: 3, kind: input, shape index: {}]   ;;  %s3102_s4 = inlined_call_operand.vmem [shape: f32[2,1,32], index: 4, kind: input, shape index: {}]   ;;  %s3103_s5 = inlined_call_operand.vmem [shape: bf16[2,32,96], index: 5, kind: input, shape index: {}]   ;;  %s3104_s6 = inlined_call_operand.vmem [shape: f32[2,1,96], index: 6, kind: input, shape index: {}]   ;;  %s3105_s7 = inlined_call_operand.vmem [shape: bf16[2,32,32], index: 7, kind: input, shape index: {}]   ;;  %s3106_s8 = inlined_call_operand.vmem [shape: f32[2,1,32], index: 8, kind: input, shape index: {}]   ;;  %s3107_s9 = inlined_call_operand.vmem [shape: f32[2,1,32], index: 9, kind: input, shape index: {}]   ;;  %s3108_s10 = inlined_call_operand.vmem [shape: f32[2,1,32], index: 10, kind: input, shape index: {}]   ;;  %s3109_s11 = inlined_call_operand.vmem [shape: bf16[2,32,128], index: 11, kind: input, shape index: {}]   ;;  %s3110_s12 = inlined_call_operand.vmem [shape: f32[2,1,128], index: 12, kind: input, shape index: {}]   ;;  %s3111_s13 = inlined_call_operand.vmem [shape: bf16[2,128,32], index: 13, kind: input, shape index: {}]   ;;  %s3112_s14 = inlined_call_operand.vmem [shape: f32[2,1,32], index: 14, kind: input, shape index: {}]   ;;  %s3113_s15 = inlined_call_operand.vmem [shape: f32[1,32], index: 15, kind: input, shape index: {}]   ;;  %s3114_s16 = inlined_call_operand.vmem [shape: f32[1,32], index: 16, kind: input, shape index: {}]   ;;  %s3115_s17 = inlined_call_operand.vmem [shape: bf16[32,128], index: 17, kind: input, shape index: {}]   ;;  %s3116_s18 = inlined_call_operand.vmem [shape: f32[1,128], index: 18, kind: input, shape index: {}]   ;;  %s3117_s19 = inlined_call_operand.hbm [shape: f32[2,1,128], index: 19, kind: output, shape index: {}]  }
   0x1   :  { %3132 = sst [smem:[#allocation18_spill]] %s3098_s0 }
   0x2   :  { %3133 = sst [smem:[#allocation19_spill]] %s3099_s1 }
   0x3   :  { %3134 = sst [smem:[#allocation20_spill]] %s3100_s2 }
   0x4   :  { %3135 = sst [smem:[#allocation21_spill]] %s3101_s3 }
   0x5   :  { %3136 = sst [smem:[#allocation22_spill]] %s3103_s5 }
   0x6   :  { %3137 = sst [smem:[#allocation23_spill]] %s3105_s7 }
   0x7   :  { %3138 = sst [smem:[#allocation24_spill]] %s3113_s15 }
   0x8   :  { %3139 = sst [smem:[#allocation25_spill]] %s3114_s16 }
   0x9   :  { %3140 = sst [smem:[#allocation26_spill]] %s3115_s17 }
   0xa   :  { %3141 = sst [smem:[#allocation27_spill]] %s3116_s18 }
   0xb   :  { %3142 = sst [smem:[#allocation28_spill]] %s3117_s19 }
   0xc   :  { %24 = vsyncpa [#allocation4], 0 }
   0xd   :  { %26 = vsyncpa [#allocation4 + $0x1], 0  ;;  %s2587_s0 = smov 0   ;;  %s2589_s30 = smov 0  }
   0xe   :  { %s2591_s20 = smov 0   ;;  %s2593_s21 = smov 0  }
   0xf   :  { %s2595_s1 = smov 0   ;;  %s2597_s22 = smov 0  }
  0x10   :  { %s2599_s2 = smov 0   ;;  %s2601_s23 = smov 0  }
  0x11 LB: > { %3143 = sst [smem:[#allocation6_spill]] %s2438_s0  ;;  %s2129_s24 = sadd.s32 4294967295, %s2466_s23   ;;  %s2466_s23 = sphi %s2601_s23, %s32_s23   ;;  %s2462_s2 = sphi %s2599_s2, %s3189_s2   ;;  %s2458_s22 = sphi %s2597_s22, %s3188_s22   ;;  %s2454_s1 = sphi %s2595_s1, %s3192_s1   ;;  %s2450_s21 = sphi %s2593_s21, %s3186_s21   ;;  %s2446_s20 = sphi %s2591_s20, %s3185_s20   ;;  %s2442_s30 = sphi %s2589_s30, %s3191_s30   ;;  %s2438_s0 = sphi %s2587_s0, %s3190_s0  }
  0x12   : > { %3144 = sst [smem:[#allocation7_spill]] %s2446_s20  ;;  %s2130_s25 = sadd.s32 4294967294, %s2466_s23  }
  0x13   : > { %3145 = sst [smem:[#allocation8_spill]] %s2450_s21  ;;  %s41_s3 = sadd.s32 1, %s2458_s22 }
  0x14   : > { %3146 = sst [smem:[#allocation9_spill]] %s2454_s1  ;;  %p42_p0 = scmp.ge.s32.totalorder %s41_s3, 2 }
  0x15   : > { %3147 = sst [smem:[#allocation10_spill]] %s2458_s22  ;;  %s44_s26 = sadd.s32 1, %s2462_s2 }
  0x16   : > { %3148 = sst [smem:[#allocation11_spill]] %s2462_s2  ;;  %p525_p1 = scmp.ne.s32.totalorder %s2446_s20, %s2442_s30 }
  0x17   : > { %3149 = sst [smem:[#allocation12_spill]] %s2466_s23  ;;  %p526_p2 = scmp.eq.s32.totalorder %s2129_s24, 3 }
  0x18   : > { %s3194_s3 = smov (%p42_p0, %s41_s3), 0  ;;  %s3196_s26 = smov (!%p42_p0, %s44_s26), %s2462_s2 }
  0x19   : > { %3150 = sst [smem:[#allocation13_spill]] %s3194_s3  ;;  %p2636_p3 = por %p526_p2, %p525_p1 }
  0x1a   : > { %p531_p4 = scmp.ne.s32.totalorder %s2442_s30, %s2438_s0  ;;  %p46_p5 = scmp.ge.s32.totalorder %s3196_s26, 2 }
  0x1b   : > { %s3151_s27 = scalar_select %p2636_p3, 1, 0 }
  0x1c   : > { %p532_p6 = scmp.eq.s32.totalorder %s2130_s25, 3  ;;  %p2133_p7 = scmp.ge.s32.totalorder %s2466_s23, 1 }
  0x1d   : > { %3152 = sst [smem:[#allocation14_spill]] %s3151_s27  ;;  %p655_p8 = scmp.lt.s32.totalorder %s2466_s23, 5 }
  0x1e   : > { %s3198_s26 = smov (%p46_p5, %s3196_s26), 0  ;;  %p2646_p9 = por %p532_p6, %p531_p4 }
  0x1f   : > { %3153 = sst [smem:[#allocation15_spill]] %s3198_s26  ;;  %p656_p10 = pnand %p2133_p7, %p655_p8 }
  0x20   : > { %s3154_s28 = scalar_select %p2646_p9, 1, 0 }
  0x21   : > { %s512_s29 = ssub.s32 %s2462_s2, %s3198_s26  ;;  %s515_s24 = sadd.s32 1, %s2446_s20 }
  0x22   : > { %3155 = sst [smem:[#allocation16_spill]] %s3154_s28  ;;  %p513_p11 = scmp.eq.s32.totalorder %s512_s29, 0 }
  0x23   : > { %659 = sbr.rel (%p656_p10) target bundleno = 2243 (0x8c3), region = 96  ;;  %p753_p12 = scmp.lt.s32.totalorder (!%p656_p10), %s2454_s1, 1 }
  0x24   : > { %s2654_s3 = scalar_select %p513_p11, %s2446_s20, %s515_s24  }
  0x25   : > { %p757_p13 = scmp.lt.s32.totalorder (!%p656_p10), %s2450_s21, 1  ;;  %s3157_s2 = sld [smem:[#allocation18_spill]] (!%p656_p10) }
  0x26   : > { %3156 = sst [smem:[#allocation17_spill]] %s2654_s3  ;;  %s3161_s15 = sand.u32 (!%p656_p10), 1, %s2442_s30  }
  0x27   : > { %s3159_s5 = sld [smem:[#allocation22_spill]] (!%p656_p10)  ;;  %s2722_s16 = scalar_lea.vmem (!%p656_p10), [#allocation3], %s3161_s15 }
  0x28   : > { %s754_s22 = scalar_select %p753_p12, %s2454_s1, 1 }
  0x29   : > { %s2661_s0 = scalar_select %p757_p13, %s2450_s21, 1 }
  0x2a   : > { %s2134_s29 = sshll.u32 %s754_s22, 3  ;;  %s3160_s7 = sld [smem:[#allocation23_spill]] }
  0x2b   : > { %s756_s25 = scalar_lea.vmem %s3157_s2, %s2134_s29  ;;  %s2224_s18 = sshll.u32 %s2661_s0, 4 }
  0x2c   : > { %s784_s23 = scalar_lea.vmem %s3108_s10, %s2661_s0  ;;  %s2704_s22 = scalar_lea.vmem %s3109_s11, %s2224_s18 }
  0x2d   : > { %s2678_s17 = scalar_lea.vmem %s3159_s5, %s2224_s18  ;;  %s792_s26 = scalar_lea.vmem %s3110_s12, %s2661_s0 }
  0x2e   : > { %s800_s19 = scalar_lea.vmem %s3112_s14, %s2661_s0  ;;  %s3162_s5 = sld [smem:[#allocation8_spill]] }
  0x30   : > { %s2687_s29 = scalar_lea.vmem %s3160_s7, %s2224_s18  ;;  %s2227_s7 = sshll.u32 %s2661_s0, 6 }
  0x31   : > { %s2718_s1 = scalar_lea.vmem %s3111_s13, %s2227_s7 }
  0x34   : > { %p2143_p0 = scmp.ne.s32.totalorder %s3162_s5, 0 }
  0x35   : > { %s3163_s24 = sld [smem:[#allocation19_spill]] (!%p2143_p0) }
  0x36   : > { %805 = sbr.rel (%p2143_p0) target bundleno = 198 (0xc6), region = 100  ;;  %s3164_s20 = sld [smem:[#allocation20_spill]] (!%p2143_p0) }
  0x3b   : > { %v808_v0 = vld [vmem:[%s3163_s24] sm:$0x3]  ;;  %vm813_vm0 = vcmask 1041408   ;;  %vm809_vm1 = vcmask 31744   ;;  %vm832_vm2 = vcmask 261120  }
  0x3c   : > { %v806_v1 = vld [vmem:[%s756_s25] sm:$0xff]  ;;  %v815_v2 = vsel %vm813_vm0, %v808_v0, 0 }
  0x3d   : > { %v807_v3 = vpack.c.bf16 %v806_v1, %v806_v1  ;;  %824 = vmatpush.bf16.msra.mxu0 %v815_v2  ;;  %v830_v4 = vld [vmem:[%s3164_s20] sm:$0xff] }
  0x40   : > { %2144 = vmatmul.msk.bf16.vlgmr.msra.gmra.mxu0 %vm809_vm1, %v807_v3 }
  0xbd   : > { %v826_v5 = vpop.f32.mrf.mxu0 }
  0xbe   : > { %v831_v6 = vadd.f32 %v830_v4, %v826_v5 }
  0xc0   : > { %833 = vst.msk [vmem:[#allocation2] sm:$0xff] %vm832_vm2, %v831_v6 }
  0xc5   : > { %v828_v7 = vpop.f32.mrf.mxu0 }
  0xc6 PF: > { %vm843_vm3 = vcmask 261120   ;;  %v2468_v12 = vmov 32.0   ;;  %v2229_v19 = vld [vmem:[%s2678_s17 + $0x8] sm:$0xff]  ;;  %v2228_v21 = vld [vmem:[%s2678_s17] sm:$0xff]  ;;  %s3165_s3 = sld [smem:[#allocation21_spill]]  ;;  %s3167_s5 = scalar_lea.vmem %s3102_s4, %s2661_s0  ;;  %vm956_vm8 = vcmask 1047556  }
  0xc7   : > { %v2731_v8 = vld [vmem:[#allocation2] sm:$0xff]  ;;  %2342 = vrcp.f32 %v2468_v12  ;;  %914 = vmatpush.bf16.msra.mxu0 %v2229_v19  ;;  %s3168_s24 = scalar_lea.vmem %s3104_s6, %s2661_s0  ;;  %s2469_s2 = smov 104   ;;  %v2477_v52 = vmov 1983009808   ;;  %v2478_v63 = vmov 1934713408  }
  0xc8   : > { %v844_v9 = vsel %vm843_vm3, %v2731_v8, 0.0  ;;  %v855_v10 = vmul.f32 %v2731_v8, %v2731_v8  ;;  %v2335_v39 = vld [vmem:[%s3167_s5] ss:$0 sm:$0xff]  ;;  %s2470_s7 = smov 96   ;;  %s2471_s20 = smov 88   ;;  %v961_v53 = vunpack.c.l.s4 %v2477_v52  ;;  %v1009_v0 = vunpack.c.l.s4 %v2478_v63 }
  0xc9   : > { %845 = vadd.xlane.f32.xlu0 %v844_v9  ;;  %v2336_v43 = vld [vmem:[%s3168_s24] ss:$0 sm:$0xff]  ;;  %s2472_s17 = smov 72   ;;  %s2473_s25 = smov 120   ;;  %vm1302_vm9 = vcmask 64512   ;;  %vm1430_vm11 = vcmask 1043456  }
  0xca   : > { %v856_v11 = vsel %vm843_vm3, %v855_v10, 0.0  ;;  %s2476_s28 = smov 64   ;;  %v2774_v57 = vunpack.c.0.s8 %v961_v53  ;;  %s2480_s15 = smov 48   ;;  %vm1627_vm12 = vcmask 130048   ;;  %vm1629_vm13 = vcmask 195584  }
  0xcb   : > { %915 = vmatpush.bf16.msra.mxu0 %v2228_v21  ;;  %s2481_s5 = smov 40   ;;  %s2482_s18 = smov 56  }
  0xcc   : > { %s3166_s27 = scalar_lea.vmem %s3165_s3, %s2661_s0  ;;  %s2474_s3 = smov 112  }
  0xcd   : > { %v2343_v13 = vpop.eup %2342  ;;  %v2334_v36 = vld [vmem:[%s3166_s27] ss:$0 sm:$0xff]  ;;  %s2475_s27 = smov 80   ;;  %s2483_s21 = smov 24  }
  0xce   : > { %v848_v14 = vmul.f32 32.0, %v2343_v13  ;;  %vm852_vm4 = vweird.f32 %v2343_v13  ;;  %s2484_s24 = smov 16  }
  0xd0   : > { %v849_v15 = vsub.f32 1.0, %v848_v14 }
  0xd1   : > { %857 = vadd.xlane.f32.xlu0 %v856_v11 }
  0xd2   : > { %v850_v16 = vmul.f32 %v2343_v13, %v849_v15 }
  0xd4   : > { %v851_v17 = vadd.f32 %v2343_v13, %v850_v16 }
  0xd6   : > { %v2739_v20 = vsel %vm852_vm4, %v2343_v13, %v851_v17  ;;  %v2785_v13 = vunpack.c.0.s8 %v1009_v0 }
 0x13c   : > { %v846_v18 = vpop.xlane.xlu0 %845 }
 0x13d   : > { %v854_v22 = vmul.f32 %v2739_v20, %v846_v18 }
 0x13f   : > { %v860_v24 = vmul.f32 %v854_v22, %v854_v22  ;;  %v863_v35 = vsub.f32 %v2731_v8, %v854_v22 }
 0x144   : > { %v858_v23 = vpop.xlane.xlu0 %857 }
 0x145   : > { %v859_v25 = vmul.f32 %v858_v23, %v2739_v20 }
 0x147   : > { %v861_v26 = vsub.f32 %v859_v25, %v860_v24 }
 0x149   : > { %v862_v27 = vmax.f32 %v861_v26, 0.0 }
 0x14b   : > { %v864_v28 = vadd.f32 1e-05, %v862_v27 }
 0x14d   : > { %2344 = vrsqrt.f32 %v864_v28  ;;  %vm871_vm6 = vweird.f32 %v864_v28 }
 0x153   : > { %v2345_v29 = vpop.eup %2344 }
 0x154   : > { %v866_v30 = vmul.f32 %v2345_v29, %v864_v28  ;;  %vm872_vm5 = vweird.f32 %v2345_v29 }
 0x155   : > { %vm873_vm7 = vmor %vm871_vm6, %vm872_vm5 }
 0x156   : > { %v867_v31 = vmul.f32 %v2345_v29, %v866_v30 }
 0x158   : > { %v868_v32 = vmul.f32 0.5, %v867_v31 }
 0x15a   : > { %v869_v33 = vsub.f32 1.5, %v868_v32 }
 0x15c   : > { %v870_v34 = vmul.f32 %v2345_v29, %v869_v33 }
 0x15e   : > { %v874_v37 = vsel %vm873_vm7, %v2345_v29, %v870_v34 }
 0x15f   : > { %v875_v38 = vmul.f32 %v874_v37, %v863_v35 }
 0x161   : > { %v879_v40 = vmul.f32 %v2334_v36, %v875_v38 }
 0x163   : > { %v883_v41 = vadd.f32 %v2335_v39, %v879_v40 }
 0x165   : > { %v884_v42 = vpack.c.bf16 %v883_v41, %v883_v41 }
 0x167   : > { %2153 = vmatmul.msk.bf16.vlgmr.msra.gmra.mxu0 %vm843_vm3, %v884_v42 }
 0x1e4   : > { %v917_v44 = vpop.f32.mrf.mxu0 }
 0x1e5   : > { %v2761_v45 = vadd.f32 %v2336_v43, %v917_v44 }
 0x1e7   : > { %928 = vrot.lane.b32.xlu0 %v2761_v45, %s2469_s2  ;;  %931 = vrot.lane.b32.xlu2 %v2761_v45, %s2470_s7  ;;  %v958_v56 = vrot.slane %v2761_v45, 4  ;;  %s2485_s2 = smov 8  }
 0x1e8   : > { %934 = vrot.lane.b32.xlu1 %v2761_v45, %s2471_s20 }
 0x1ec   : > { %v919_v46 = vpop.f32.mrf.mxu0 }
 0x1ef   : > { %940 = vrot.lane.b32.xlu2 %v2761_v45, %s2472_s17  ;;  %s3169_s17 = scalar_lea.vmem %s3106_s8, %s2661_s0 }
 0x1f0   : > { %922 = vrot.lane.b32.xlu1 %v2761_v45, %s2473_s25  ;;  %s3170_s25 = scalar_lea.vmem %s3107_s9, %s2661_s0 }
 0x1f7   : > { %925 = vrot.lane.b32.xlu2 %v2761_v45, %s2474_s3 }
 0x1f8   : > { %937 = vrot.lane.b32.xlu1 %v2761_v45, %s2475_s27 }
 0x200   : > { %943 = vrot.lane.b32.xlu1 %v2761_v45, %s2476_s28 }
 0x241   : > { %v932_v47 = vpop.permute.xlu2 %931 }
 0x242   : > { %v982_v18 = vrot.slane %v932_v47, 4 }
 0x249   : > { %v941_v48 = vpop.permute.xlu2 %940 }
 0x24a   : > { %v992_v5 = vrot.slane %v941_v48, 4 }
 0x251   : > { %v926_v49 = vpop.permute.xlu2 %925 }
 0x252   : > { %v955_v51 = vrot.slane %v926_v49, 4  ;;  %v959_v58 = vsel %vm956_vm8, %v926_v49, %v958_v56 }
 0x253   : > { %v967_v3 = vperm.slane %v959_v58, %v2774_v57 }
 0x254   : > { %v957_v55 = vsel %vm956_vm8, %v955_v51, %v2761_v45 }
 0x255   : > { %v963_v61 = vperm.slane %v957_v55, %v2774_v57  ;;  %v1018_v14 = vrot.slane %v967_v3, 4 }
 0x257   : > { %v1006_v9 = vrot.slane %v963_v61, 4 }
 0x259   : > { %v929_v54 = vpop.permute.xlu0 %928 }
 0x25a   : > { %v935_v50 = vpop.permute.xlu1 %934  ;;  %v968_v59 = vrot.slane %v929_v54, 4 }
 0x25b   : > { %v994_v60 = vrot.slane %v935_v50, 4  ;;  %v993_v12 = vsel %vm956_vm8, %v992_v5, %v935_v50 }
 0x25c   : > { %v999_v19 = vperm.slane %v993_v12, %v2774_v57 }
 0x25d   : > { %v995_v6 = vsel %vm956_vm8, %v941_v48, %v994_v60 }
 0x25e   : > { %v1003_v15 = vperm.slane %v995_v6, %v2774_v57  ;;  %v1028_v34 = vrot.slane %v999_v19, 4 }
 0x260   : > { %v1040_v27 = vrot.slane %v1003_v15, 4 }
 0x262   : > { %v923_v62 = vpop.permute.xlu1 %922 }
 0x263   : > { %v969_v1 = vsel %vm956_vm8, %v968_v59, %v923_v62  ;;  %v970_v2 = vrot.slane %v923_v62, 4 }
 0x264   : > { %v975_v4 = vperm.slane %v969_v1, %v2774_v57 }
 0x265   : > { %v971_v7 = vsel %vm956_vm8, %v929_v54, %v970_v2 }
 0x266   : > { %v979_v10 = vperm.slane %v971_v7, %v2774_v57  ;;  %v1004_v11 = vrot.slane %v975_v4, 4  ;;  %v1007_v16 = vsel %vm956_vm8, %v975_v4, %v1006_v9 }
 0x267   : > { %v1015_v25 = vperm.slane %v1007_v16, %v2785_v13 }
 0x268   : > { %v1016_v17 = vrot.slane %v979_v10, 4  ;;  %v1005_v21 = vsel %vm956_vm8, %v1004_v11, %v963_v61  ;;  %v1019_v23 = vsel %vm956_vm8, %v979_v10, %v1018_v14 }
 0x269   : > { %v1011_v30 = vperm.slane %v1005_v21, %v2785_v13  ;;  %v1027_v31 = vperm.slane %v1019_v23, %v2785_v13  ;;  %v1058_v36 = vrot.slane %v1015_v25, 4 }
 0x26a   : > { %v1017_v22 = vsel %vm956_vm8, %v1016_v17, %v967_v3  ;;  %v938_v24 = vpop.permute.xlu1 %937 }
 0x26b   : > { %v980_v26 = vrot.slane %v938_v24, 4  ;;  %v1023_v28 = vperm.slane %v1017_v22, %v2785_v13  ;;  %v983_v29 = vsel %vm956_vm8, %v938_v24, %v982_v18  ;;  %v1054_v43 = vrot.slane %v1011_v30, 4 }
 0x26c   : > { %v991_v33 = vperm.slane %v983_v29, %v2774_v57  ;;  %v1066_v44 = vrot.slane %v1027_v31, 4 }
 0x26d   : > { %v981_v32 = vsel %vm956_vm8, %v980_v26, %v932_v47  ;;  %v1062_v39 = vrot.slane %v1023_v28, 4 }
 0x26e   : > { %v987_v35 = vperm.slane %v981_v32, %v2774_v57  ;;  %v1041_v37 = vsel %vm956_vm8, %v1040_v27, %v991_v33  ;;  %v1042_v38 = vrot.slane %v991_v33, 4 }
 0x26f   : > { %v1047_v42 = vperm.slane %v1041_v37, %v2785_v13 }
 0x270   : > { %v1029_v40 = vsel %vm956_vm8, %v1028_v34, %v987_v35  ;;  %v1030_v41 = vrot.slane %v987_v35, 4  ;;  %v1043_v47 = vsel %vm956_vm8, %v1003_v15, %v1042_v38 }
 0x271   : > { %v1035_v46 = vperm.slane %v1029_v40, %v2785_v13  ;;  %v1051_v49 = vperm.slane %v1043_v47, %v2785_v13  ;;  %v1060_v50 = vrot.slane %v1047_v42, 4  ;;  %v1063_v51 = vsel %vm956_vm8, %v1047_v42, %v1062_v39 }
 0x272   : > { %v1031_v48 = vsel %vm956_vm8, %v999_v19, %v1030_v41  ;;  %v1162_v55 = vrot.slane %v1063_v51, 4 }
 0x273   : > { %v1039_v52 = vperm.slane %v1031_v48, %v2785_v13  ;;  %v1052_v53 = vrot.slane %v1035_v46, 4  ;;  %v1055_v54 = vsel %vm956_vm8, %v1035_v46, %v1054_v43  ;;  %v1061_v56 = vsel %vm956_vm8, %v1060_v50, %v1023_v28 }
 0x274   : > { %v1064_v58 = vrot.slane %v1051_v49, 4  ;;  %v1067_v59 = vsel %vm956_vm8, %v1051_v49, %v1066_v44  ;;  %v1138_v60 = vrot.slane %v1055_v54, 4  ;;  %v1150_v62 = vrot.slane %v1061_v56, 4 }
 0x275   : > { %v1056_v61 = vrot.slane %v1039_v52, 4  ;;  %v1160_v63 = vrot.slane %v1067_v59, 4  ;;  %v1053_v1 = vsel %vm956_vm8, %v1052_v53, %v1011_v30  ;;  %v1059_v2 = vsel %vm956_vm8, %v1039_v52, %v1058_v36 }
 0x276   : > { %v1065_v0 = vsel %vm956_vm8, %v1064_v58, %v1027_v31  ;;  %v1163_v3 = vsel %vm956_vm8, %v1067_v59, %v1162_v55  ;;  %v1126_v7 = vrot.slane %v1053_v1, 4  ;;  %v1136_v11 = vrot.slane %v1059_v2, 4 }
 0x277   : > { %v1148_v4 = vrot.slane %v1065_v0, 4  ;;  %v1161_v5 = vsel %vm956_vm8, %v1160_v63, %v1063_v51  ;;  %v1057_v6 = vsel %vm956_vm8, %v1056_v61, %v1015_v25  ;;  %v1139_v12 = vsel %vm956_vm8, %v1059_v2, %v1138_v60 }
 0x278   : > { %v1167_v9 = vperm.slane %v1161_v5, %v2774_v57  ;;  %v1124_v10 = vrot.slane %v1057_v6, 4  ;;  %v1127_v15 = vsel %vm956_vm8, %v1057_v6, %v1126_v7  ;;  %v1147_v16 = vperm.slane %v1139_v12, %v2774_v57 }
 0x279   : > { %v1149_v14 = vsel %vm956_vm8, %v1148_v4, %v1061_v56  ;;  %v1151_v17 = vsel %vm956_vm8, %v1065_v0, %v1150_v62  ;;  %v1135_v18 = vperm.slane %v1127_v15, %v2774_v57  ;;  %v1171_v21 = vperm.slane %v1163_v3, %v2774_v57 }
 0x27a   : > { %v1159_v19 = vperm.slane %v1151_v17, %v2774_v57  ;;  %v1125_v22 = vsel %vm956_vm8, %v1124_v10, %v1053_v1  ;;  %v1184_v23 = vrot.slane %v1147_v16, 4  ;;  %v1137_v25 = vsel %vm956_vm8, %v1136_v11, %v1055_v54 }
 0x27b   : > { %v1131_v24 = vperm.slane %v1125_v22, %v2774_v57  ;;  %v1155_v26 = vperm.slane %v1149_v14, %v2774_v57  ;;  %v1208_v27 = vrot.slane %v1171_v21, 4  ;;  %v1186_v28 = vrot.slane %v1135_v18, 4 }
 0x27c   : > { %v1210_v29 = vrot.slane %v1159_v19, 4  ;;  %v1143_v30 = vperm.slane %v1137_v25, %v2774_v57  ;;  %v1185_v31 = vsel %vm956_vm8, %v1184_v23, %v1135_v18  ;;  %v1196_v32 = vrot.slane %v1167_v9, 4 }
 0x27d   : > { %v1174_v33 = vrot.slane %v1131_v24, 4  ;;  %v1198_v34 = vrot.slane %v1155_v26, 4  ;;  %v1191_v35 = vperm.slane %v1185_v31, %v2785_v13  ;;  %v1209_v36 = vsel %vm956_vm8, %v1208_v27, %v1159_v19 }
 0x27e   : > { %v1187_v37 = vsel %vm956_vm8, %v1147_v16, %v1186_v28  ;;  %v1211_v38 = vsel %vm956_vm8, %v1171_v21, %v1210_v29  ;;  %v1215_v39 = vperm.slane %v1209_v36, %v2785_v13  ;;  %v1172_v42 = vrot.slane %v1143_v30, 4 }
 0x27f   : > { %v1195_v40 = vperm.slane %v1187_v37, %v2785_v13  ;;  %v1219_v41 = vperm.slane %v1211_v38, %v2785_v13  ;;  %v1230_v43 = vrot.slane %v1191_v35, 4  ;;  %v1197_v44 = vsel %vm956_vm8, %v1196_v32, %v1155_v26 }
 0x280   : > { %v1175_v46 = vsel %vm956_vm8, %v1143_v30, %v1174_v33  ;;  %v1199_v47 = vsel %vm956_vm8, %v1167_v9, %v1198_v34  ;;  %v1228_v48 = vrot.slane %v1215_v39, 4  ;;  %v1173_v51 = vsel %vm956_vm8, %v1172_v42, %v1131_v24 }
 0x281   : > { %v1232_v49 = vrot.slane %v1219_v41, 4  ;;  %v1234_v50 = vrot.slane %v1195_v40, 4  ;;  %v1231_v52 = vsel %vm956_vm8, %v1215_v39, %v1230_v43  ;;  %v1179_v53 = vperm.slane %v1173_v51, %v2785_v13 }
 0x282   : > { %v1203_v54 = vperm.slane %v1197_v44, %v2785_v13  ;;  %v1183_v55 = vperm.slane %v1175_v46, %v2785_v13  ;;  %v1229_v56 = vsel %vm956_vm8, %v1228_v48, %v1191_v35  ;;  %v1295_v58 = vpack.c.bf16 %v1231_v52, %v1231_v52 }
 0x283   : > { %v1233_v59 = vsel %vm956_vm8, %v1232_v49, %v1195_v40  ;;  %v1235_v60 = vsel %vm956_vm8, %v1219_v41, %v1234_v50  ;;  %v1294_v61 = vpack.c.bf16 %v1229_v56, %v1229_v56  ;;  %v1222_v2 = vrot.slane %v1179_v53, 4  ;;  %v944_v41 = vpop.permute.xlu1 %943 }
 0x284   : > { %v1296_v62 = vpack.c.bf16 %v1233_v59, %v1233_v59  ;;  %v1297_v63 = vpack.c.bf16 %v1235_v60, %v1235_v60  ;;  %v1326_v0 = vsel %vm1302_vm9, %v1295_v58, 0  ;;  %v1220_v1 = vrot.slane %v1203_v54, 4 }
 0x285   : > { %v1207_v3 = vperm.slane %v1199_v47, %v2785_v13  ;;  %v1307_v4 = vsel %vm1302_vm9, %v1294_v61, 0  ;;  %1335 = vmatpush.bf16.xpose.msra.mxu2 %v1326_v0  ;;  %v1226_v7 = vrot.slane %v1183_v55, 4  ;;  %v1223_v10 = vsel %vm956_vm8, %v1203_v54, %v1222_v2 }
 0x286   : > { %v1345_v5 = vsel %vm1302_vm9, %v1296_v62, 0  ;;  %v1364_v6 = vsel %vm1302_vm9, %v1297_v63, 0  ;;  %1316 = vmatpush.bf16.xpose.msra.mxu1 %v1307_v4  ;;  %v1221_v11 = vsel %vm956_vm8, %v1220_v1, %v1179_v53  ;;  %v1291_v15 = vpack.c.bf16 %v1223_v10, %v1223_v10 }
 0x287   : > { %1354 = vmatpush.bf16.xpose.msra.mxu3 %v1345_v5  ;;  %v1224_v9 = vrot.slane %v1207_v3, 4  ;;  %1373 = vmatpush.bf16.xpose.msrb.mxu0 %v1364_v6  ;;  %v1227_v14 = vsel %vm956_vm8, %v1207_v3, %v1226_v7  ;;  %v1290_v16 = vpack.c.bf16 %v1221_v11, %v1221_v11  ;;  %v835_v19 = vlaneseq }
 0x288   : > { %v1293_v18 = vpack.c.bf16 %v1227_v14, %v1227_v14  ;;  %v2479_v23 = vmov -1e+30   ;;  %v1070_v63 = vrot.slane %v944_v41, 4 }
 0x289   : > { %v1225_v12 = vsel %vm956_vm8, %v1224_v9, %v1183_v55  ;;  %v836_v21 = vshrl.u32 %v835_v19, 7  ;;  %v838_v22 = vand.u32 127, %v835_v19 }
 0x28a   : > { %v1292_v17 = vpack.c.bf16 %v1225_v12, %v1225_v12 }
 0x28b   : > { %vm839_vm10 = vcmp.le.s32.totalorder %v838_v22, %v836_v21 }
 0x28c   : > { %2155 = vmatmul.msk.bf16.vlgmr.msra.gmra.mxu2 %vm1302_vm9, %v1291_v15  ;;  %v840_v24 = vsel %vm839_vm10, 0.0, %v2479_v23 }
 0x28d   : > { %2154 = vmatmul.msk.bf16.vlgmr.msra.gmra.mxu1 %vm1302_vm9, %v1290_v16 }
 0x28e   : > { %2156 = vmatmul.msk.bf16.vlgmr.msra.gmra.mxu3 %vm1302_vm9, %v1292_v17  ;;  %2157 = vmatmul.msk.bf16.vlgmr.msrb.gmra.mxu0 %vm1302_vm9, %v1293_v18 }
 0x30a   : > { %v1318_v25 = vpop.f32.mrf.mxu1 }
 0x30b   : > { %v1319_v26 = vadd.f32 %v1318_v25, %v840_v24  ;;  %v1375_v27 = vpop.f32.mrf.mxu0 }
 0x30c   : > { %v1376_v28 = vadd.f32 %v1375_v27, %v840_v24 }
 0x30d   : > { %v1379_v29 = vsel %vm1302_vm9, %v1319_v26, -inf }
 0x30e   : > { %1380 = vmax.xlane.f32.xlu0 %v1379_v29  ;;  %v1388_v30 = vsel %vm1302_vm9, %v1376_v28, -inf }
 0x30f   : > { %1389 = vmax.xlane.f32.xlu2 %v1388_v30  ;;  %v1337_v31 = vpop.f32.mrf.mxu2 }
 0x310   : > { %v1338_v35 = vadd.f32 %v1337_v31, %v840_v24 }
 0x311   : > { %v1356_v32 = vpop.f32.mrf.mxu3 }
 0x312   : > { %v1357_v33 = vadd.f32 %v1356_v32, %v840_v24  ;;  %v1320_v34 = vpop.f32.mrf.mxu1  ;;  %v1382_v38 = vsel %vm1302_vm9, %v1338_v35, -inf }
 0x313   : > { %v1377_v36 = vpop.f32.mrf.mxu0 }
 0x314   : > { %v1385_v37 = vsel %vm1302_vm9, %v1357_v33, -inf }
 0x315   : > { %1386 = vmax.xlane.f32.xlu1 %v1385_v37 }
 0x317   : > { %v1339_v39 = vpop.f32.mrf.mxu2  ;;  %1383 = vmax.xlane.f32.xlu2 %v1382_v38 }
 0x319   : > { %v1358_v40 = vpop.f32.mrf.mxu3 }
 0x322   : > { %949 = vrot.lane.b32.xlu0 %v2761_v45, %s2480_s15 }
 0x32e   : > { %952 = vrot.lane.b32.xlu1 %v2761_v45, %s2481_s5 }
 0x32f   : > { %946 = vrot.lane.b32.xlu2 %v2761_v45, %s2482_s18 }
 0x381   : > { %v1381_v42 = vpop.xlane.xlu0 %1380 }
 0x382   : > { %v1391_v43 = vsub.f32 %v1319_v26, %v1381_v42  ;;  %v1390_v44 = vpop.xlane.xlu2 %1389 }
 0x383   : > { %v1394_v49 = vsub.f32 %v1376_v28, %v1390_v44 }
 0x384   : > { %v1395_v46 = vmul.f32 1.442695, %v1391_v43 }
 0x385   : > { %v1401_v45 = vmul.f32 1.442695, %v1394_v49 }
 0x386   : > { %2346 = vpow2.f32 %v1395_v46 }
 0x388   : > { %v1387_v47 = vpop.xlane.xlu1 %1386 }
 0x389   : > { %v1393_v48 = vsub.f32 %v1357_v33, %v1387_v47 }
 0x38a   : > { %v1384_v51 = vpop.xlane.xlu2 %1383 }
 0x38b   : > { %v1399_v50 = vmul.f32 1.442695, %v1393_v48  ;;  %v1392_v52 = vsub.f32 %v1338_v35, %v1384_v51 }
 0x38c   : > { %v2872_v53 = vpop.eup %2346 }
 0x38d   : > { %2348 = vpow2.f32 %v1399_v50  ;;  %v1397_v54 = vmul.f32 1.442695, %v1392_v52  ;;  %v1403_v55 = vsel %vm1302_vm9, %v2872_v53, 0.0 }
 0x38e   : > { %1404 = vadd.xlane.f32.xlu1 %v1403_v55 }
 0x38f   : > { %2350 = vpow2.f32 %v1397_v54 }
 0x390   : > { %2352 = vpow2.f32 %v1401_v45 }
 0x392   : > { %v947_v2 = vpop.permute.xlu2 %946 }
 0x393   : > { %v2876_v56 = vpop.eup %2348  ;;  %v1082_v6 = vrot.slane %v947_v2, 4 }
 0x394   : > { %v1409_v58 = vsel %vm1302_vm9, %v2876_v56, 0.0  ;;  %v950_v60 = vpop.permute.xlu0 %949 }
 0x395   : > { %1410 = vadd.xlane.f32.xlu2 %v1409_v58  ;;  %v2880_v59 = vpop.eup %2350  ;;  %v1068_v0 = vrot.slane %v950_v60, 4  ;;  %v1071_v1 = vsel %vm956_vm8, %v950_v60, %v1070_v63 }
 0x396   : > { %v1406_v61 = vsel %vm1302_vm9, %v2880_v59, 0.0  ;;  %v2884_v62 = vpop.eup %2352  ;;  %v1079_v5 = vperm.slane %v1071_v1, %v2774_v57 }
 0x397   : > { %1407 = vadd.xlane.f32.xlu0 %v1406_v61  ;;  %v1412_v3 = vsel %vm1302_vm9, %v2884_v62, 0.0  ;;  %v1069_v4 = vsel %vm956_vm8, %v1068_v0, %v944_v41 }
 0x398   : > { %v1075_v7 = vperm.slane %v1069_v4, %v2774_v57  ;;  %v1106_v12 = vrot.slane %v1079_v5, 4 }
 0x39a   : > { %v1094_v16 = vrot.slane %v1075_v7, 4 }
 0x39d   : > { %1413 = vadd.xlane.f32.xlu2 %v1412_v3 }
 0x3a0   : > { %v953_v9 = vpop.permute.xlu1 %952 }
 0x3a1   : > { %v1080_v10 = vrot.slane %v953_v9, 4  ;;  %v1083_v11 = vsel %vm956_vm8, %v953_v9, %v1082_v6 }
 0x3a2   : > { %v1091_v14 = vperm.slane %v1083_v11, %v2774_v57 }
 0x3a3   : > { %v1081_v15 = vsel %vm956_vm8, %v1080_v10, %v947_v2 }
 0x3a4   : > { %v1087_v17 = vperm.slane %v1081_v15, %v2774_v57  ;;  %v1104_v18 = vrot.slane %v1091_v14, 4  ;;  %v1107_v19 = vsel %vm956_vm8, %v1091_v14, %v1106_v12 }
 0x3a5   : > { %v1115_v21 = vperm.slane %v1107_v19, %v2785_v13 }
 0x3a6   : > { %v1092_v22 = vrot.slane %v1087_v17, 4  ;;  %v1095_v23 = vsel %vm956_vm8, %v1087_v17, %v1094_v16  ;;  %v1105_v24 = vsel %vm956_vm8, %v1104_v18, %v1079_v5 }
 0x3a7   : > { %v1103_v25 = vperm.slane %v1095_v23, %v2785_v13  ;;  %v1111_v26 = vperm.slane %v1105_v24, %v2785_v13  ;;  %v1122_v27 = vrot.slane %v1115_v21, 4 }
 0x3a8   : > { %v1093_v28 = vsel %vm956_vm8, %v1092_v22, %v1075_v7 }
 0x3a9   : > { %v1099_v29 = vperm.slane %v1093_v28, %v2785_v13  ;;  %v1118_v30 = vrot.slane %v1103_v25, 4  ;;  %v1120_v31 = vrot.slane %v1111_v26, 4  ;;  %v1123_v32 = vsel %vm956_vm8, 0.0, %v1122_v27 }
 0x3aa   : > { %v1247_v33 = vsel %vm956_vm8, %v1122_v27, %v1111_v26  ;;  %v1252_v34 = vrot.slane %v1123_v32, 4 }
 0x3ab   : > { %v1116_v35 = vrot.slane %v1099_v29, 4  ;;  %v1119_v36 = vsel %vm956_vm8, 0.0, %v1118_v30  ;;  %v1121_v37 = vsel %vm956_vm8, 0.0, %v1120_v31  ;;  %v1251_v38 = vperm.slane %v1247_v33, %v2774_v57 }
 0x3ac   : > { %v1241_v39 = vrot.slane %v1119_v36, 4  ;;  %v1253_v40 = vsel %vm956_vm8, %v1252_v34, %v1121_v37  ;;  %v1236_v41 = vsel %vm956_vm8, %v1118_v30, %v1099_v29 }
 0x3ad   : > { %v1117_v42 = vsel %vm956_vm8, 0.0, %v1116_v35  ;;  %v1240_v43 = vperm.slane %v1236_v41, %v2774_v57  ;;  %v1257_v44 = vperm.slane %v1253_v40, %v2774_v57  ;;  %v1272_v46 = vrot.slane %v1251_v38, 4 }
 0x3ae   : > { %v1242_v47 = vsel %vm956_vm8, %v1241_v39, %v1117_v42 }
 0x3af   : > { %v1246_v48 = vperm.slane %v1242_v47, %v2774_v57  ;;  %v1260_v49 = vrot.slane %v1240_v43, 4  ;;  %v1273_v50 = vsel %vm956_vm8, %v1257_v44, %v1272_v46  ;;  %v1270_v51 = vrot.slane %v1257_v44, 4 }
 0x3b0   : > { %v1281_v52 = vperm.slane %v1273_v50, %v2785_v13 }
 0x3b1   : > { %v1261_v54 = vsel %vm956_vm8, %v1246_v48, %v1260_v49  ;;  %v1258_v55 = vrot.slane %v1246_v48, 4  ;;  %v1271_v45 = vsel %vm956_vm8, %v1270_v51, %v1251_v38 }
 0x3b2   : > { %v1269_v58 = vperm.slane %v1261_v54, %v2785_v13  ;;  %v1286_v60 = vrot.slane %v1281_v52, 4  ;;  %v1277_v61 = vperm.slane %v1271_v45, %v2785_v13 }
 0x3b3   : > { %v1259_v63 = vsel %vm956_vm8, %v1258_v55, %v1240_v43 }
 0x3b4   : > { %v1287_v0 = vsel %vm956_vm8, %v1286_v60, %v1269_v58  ;;  %v1288_v1 = vrot.slane %v1269_v58, 4  ;;  %v1265_v2 = vperm.slane %v1259_v63, %v2785_v13  ;;  %v1282_v3 = vrot.slane %v1277_v61, 4 }
 0x3b5   : > { %v1300_v4 = vpack.c.bf16 %v1287_v0, %v1287_v0 }
 0x3b6   : > { %v1283_v5 = vsel %vm956_vm8, %v1282_v3, %v1265_v2  ;;  %v1289_v6 = vsel %vm956_vm8, %v1281_v52, %v1288_v1  ;;  %v1284_v7 = vrot.slane %v1265_v2, 4 }
 0x3b7   : > { %v1470_v9 = vsel %vm1430_vm11, %v1300_v4, 0  ;;  %v1298_v10 = vpack.c.bf16 %v1283_v5, %v1283_v5  ;;  %v1301_v11 = vpack.c.bf16 %v1289_v6, %v1289_v6 }
 0x3b8   : > { %1479 = vmatpush.bf16.msrb.mxu3 %v1470_v9  ;;  %v1285_v12 = vsel %vm956_vm8, %v1277_v61, %v1284_v7 }
 0x3b9   : > { %v1432_v14 = vsel %vm1430_vm11, %v1298_v10, 0  ;;  %v1489_v15 = vsel %vm1430_vm11, %v1301_v11, 0  ;;  %v1299_v16 = vpack.c.bf16 %v1285_v12, %v1285_v12 }
 0x3ba   : > { %1441 = vmatpush.bf16.msrb.mxu1 %v1432_v14  ;;  %1498 = vmatpush.bf16.msra.mxu0 %v1489_v15 }
 0x3bb   : > { %v1451_v17 = vsel %vm1430_vm11, %v1299_v16, 0 }
 0x3bc   : > { %1460 = vmatpush.bf16.msrb.mxu2 %v1451_v17 }
 0x401   : > { %v1405_v18 = vpop.xlane.xlu1 %1404 }
 0x402   : > { %2354 = vrcp.f32 %v1405_v18 }
 0x408   : > { %v1411_v19 = vpop.xlane.xlu2 %1410  ;;  %v2355_v21 = vpop.eup %2354 }
 0x409   : > { %2356 = vrcp.f32 %v1411_v19  ;;  %v1419_v22 = vmul.f32 %v2355_v21, %v2872_v53 }
 0x40a   : > { %v1408_v23 = vpop.xlane.xlu0 %1407 }
 0x40b   : > { %v1423_v24 = vpack.c.bf16 %v1419_v22, %v1419_v22  ;;  %2358 = vrcp.f32 %v1408_v23 }
 0x40d   : > { %2158 = vmatmul.msk.bf16.vlgmr.msrb.gmra.mxu1 %vm1302_vm9, %v1423_v24 }
 0x40f   : > { %v2357_v25 = vpop.eup %2356 }
 0x410   : > { %v1421_v26 = vmul.f32 %v2357_v25, %v2876_v56  ;;  %v1414_v27 = vpop.xlane.xlu2 %1413 }
 0x411   : > { %2360 = vrcp.f32 %v1414_v27  ;;  %v2359_v28 = vpop.eup %2358 }
 0x412   : > { %v1425_v29 = vpack.c.bf16 %v1421_v26, %v1421_v26  ;;  %v1420_v30 = vmul.f32 %v2359_v28, %v2880_v59 }
 0x414   : > { %2160 = vmatmul.msk.bf16.vlgmr.msrb.gmra.mxu3 %vm1302_vm9, %v1425_v29  ;;  %v1424_v31 = vpack.c.bf16 %v1420_v30, %v1420_v30 }
 0x416   : > { %2159 = vmatmul.msk.bf16.vlgmr.msrb.gmra.mxu2 %vm1302_vm9, %v1424_v31 }
 0x417   : > { %v2361_v32 = vpop.eup %2360 }
 0x418   : > { %v1422_v53 = vmul.f32 %v2361_v32, %v2884_v62 }
 0x41a   : > { %v1426_v33 = vpack.c.bf16 %v1422_v53, %v1422_v53 }
 0x41c   : > { %2161 = vmatmul.msk.bf16.vlgmr.msra.gmra.mxu0 %vm1302_vm9, %v1426_v33 }
 0x48a   : > { %v1443_v34 = vpop.f32.mrf.mxu1 }
 0x48b   : > { %v1506_v56 = vrot.slane %v1443_v34, 4 }
 0x492   : > { %v1445_v35 = vpop.f32.mrf.mxu1 }
 0x497   : > { %v1481_v36 = vpop.f32.mrf.mxu3 }
 0x498   : > { %v1504_v37 = vrot.slane %v1481_v36, 4  ;;  %v1507_v38 = vsel %vm956_vm8, %v1481_v36, %v1506_v56 }
 0x499   : > { %v1500_v39 = vpop.f32.mrf.mxu0  ;;  %v1515_v40 = vperm.slane %v1507_v38, %v2774_v57  ;;  %v1462_v42 = vpop.f32.mrf.mxu2 }
 0x49a   : > { %v1505_v59 = vsel %vm956_vm8, %v1504_v37, %v1443_v34  ;;  %v1516_v41 = vrot.slane %v1500_v39, 4  ;;  %v1518_v62 = vrot.slane %v1462_v42, 4 }
 0x49b   : > { %v1511_v43 = vperm.slane %v1505_v59, %v2774_v57  ;;  %v1542_v49 = vrot.slane %v1515_v40, 4 }
 0x49c   : > { %v1517_v44 = vsel %vm956_vm8, %v1516_v41, %v1462_v42  ;;  %v1519_v47 = vsel %vm956_vm8, %v1500_v39, %v1518_v62  ;;  %v2231_v41 = vld [vmem:[%s2687_s29 + $0x8] sm:$0xff] }
 0x49d   : > { %v1530_v46 = vrot.slane %v1511_v43, 4  ;;  %v1523_v48 = vperm.slane %v1517_v44, %v2774_v57  ;;  %v1527_v50 = vperm.slane %v1519_v47, %v2774_v57  ;;  %1661 = vmatpush.bf16.msra.mxu1 %v2231_v41 }
 0x49f   : > { %v1528_v51 = vrot.slane %v1523_v48, 4  ;;  %v1531_v52 = vsel %vm956_vm8, %v1523_v48, %v1530_v46  ;;  %v1483_v54 = vpop.f32.mrf.mxu3  ;;  %v1540_v45 = vrot.slane %v1527_v50, 4  ;;  %v1543_v58 = vsel %vm956_vm8, %v1527_v50, %v1542_v49  ;;  %v2337_v49 = vld [vmem:[%s3169_s17] ss:$0 sm:$0xff] }
 0x4a0   : > { %v1539_v55 = vperm.slane %v1531_v52, %v2785_v13  ;;  %v1551_v61 = vperm.slane %v1543_v58, %v2785_v13 }
 0x4a1   : > { %v1529_v60 = vsel %vm956_vm8, %v1528_v51, %v1511_v43  ;;  %v1502_v63 = vpop.f32.mrf.mxu0  ;;  %v1541_v1 = vsel %vm956_vm8, %v1540_v45, %v1515_v40  ;;  %v1464_v3 = vpop.f32.mrf.mxu2 }
 0x4a2   : > { %v1535_v0 = vperm.slane %v1529_v60, %v2785_v13  ;;  %v1554_v2 = vrot.slane %v1539_v55, 4  ;;  %v1547_v4 = vperm.slane %v1541_v1, %v2785_v13  ;;  %v1558_v5 = vrot.slane %v1551_v61, 4  ;;  %v2233_v60 = vld [vmem:[%s2704_s22 + $0x8] sm:$0xff] }
 0x4a3   : > { %1734 = vmatpush.bf16.msra.mxu2 %v2233_v60 }
 0x4a4   : > { %v1552_v6 = vrot.slane %v1535_v0, 4  ;;  %v1555_v7 = vsel %vm956_vm8, 0.0, %v1554_v2  ;;  %v1560_v9 = vsel %vm956_vm8, %v1554_v2, %v1535_v0  ;;  %v1556_v10 = vrot.slane %v1547_v4, 4  ;;  %v2232_v0 = vld [vmem:[%s2704_s22] sm:$0xff] }
 0x4a5   : > { %v1559_v11 = vsel %vm956_vm8, 0.0, %v1558_v5  ;;  %v1564_v12 = vperm.slane %v1560_v9, %v2774_v57  ;;  %v1565_v14 = vrot.slane %v1555_v7, 4  ;;  %v1571_v17 = vsel %vm956_vm8, %v1558_v5, %v1547_v4 }
 0x4a6   : > { %v1553_v15 = vsel %vm956_vm8, 0.0, %v1552_v6  ;;  %v1576_v16 = vrot.slane %v1559_v11, 4  ;;  %v1557_v18 = vsel %vm956_vm8, 0.0, %v1556_v10  ;;  %v1575_v21 = vperm.slane %v1571_v17, %v2774_v57 }
 0x4a7   : > { %v1566_v19 = vsel %vm956_vm8, %v1565_v14, %v1553_v15  ;;  %v1584_v22 = vrot.slane %v1564_v12, 4  ;;  %1735 = vmatpush.bf16.msra.mxu2 %v2232_v0  ;;  %v2338_v15 = vld [vmem:[%s3170_s25] ss:$0 sm:$0xff] }
 0x4a8   : > { %v1570_v23 = vperm.slane %v1566_v19, %v2774_v57  ;;  %v1577_v24 = vsel %vm956_vm8, %v1576_v16, %v1557_v18  ;;  %v1596_v26 = vrot.slane %v1575_v21, 4  ;;  %v2339_v18 = vld [vmem:[%s784_s23] ss:$0 sm:$0xff] }
 0x4a9   : > { %v1581_v25 = vperm.slane %v1577_v24, %v2774_v57  ;;  %v2240_v24 = vld [vmem:[%s2718_s1 + $0x30] sm:$0xff] }
 0x4aa   : > { %v1585_v27 = vsel %vm956_vm8, %v1570_v23, %v1584_v22  ;;  %v1582_v28 = vrot.slane %v1570_v23, 4  ;;  %v2241_v23 = vld [vmem:[%s2718_s1 + $0x38] sm:$0xff] }
 0x4ab   : > { %v1593_v29 = vperm.slane %v1585_v27, %v2785_v13  ;;  %v1597_v30 = vsel %vm956_vm8, %v1581_v25, %v1596_v26  ;;  %v1594_v31 = vrot.slane %v1581_v25, 4  ;;  %1836 = vmatpush.bf16.msra.mxu3 %v2241_v23  ;;  %v2239_v25 = vld [vmem:[%s2718_s1 + $0x28] sm:$0xff]  ;;  %v2340_v26 = vld [vmem:[%s792_s26] ss:$0 sm:$0xff]  ;;  %s3171_s26 = sld [smem:[#allocation8_spill]] }
 0x4ac   : > { %v1605_v32 = vperm.slane %v1597_v30, %v2785_v13  ;;  %v1583_v53 = vsel %vm956_vm8, %v1582_v28, %v1564_v12  ;;  %v2238_v27 = vld [vmem:[%s2718_s1 + $0x20] sm:$0xff] }
 0x4ad   : > { %v1612_v33 = vrot.slane %v1593_v29, 4  ;;  %v1589_v34 = vperm.slane %v1583_v53, %v2785_v13  ;;  %v1595_v35 = vsel %vm956_vm8, %v1594_v31, %v1575_v21  ;;  %v2237_v31 = vld [vmem:[%s2718_s1 + $0x18] sm:$0xff] }
 0x4ae   : > { %v1610_v57 = vrot.slane %v1605_v32, 4  ;;  %v1601_v56 = vperm.slane %v1595_v35, %v2785_v13  ;;  %v2230_v13 = vld [vmem:[%s2687_s29] sm:$0xff] }
 0x4af   : > { %v1613_v36 = vsel %vm956_vm8, %v1605_v32, %v1612_v33  ;;  %v1608_v37 = vrot.slane %v1589_v34, 4  ;;  %1662 = vmatpush.bf16.msra.mxu1 %v2230_v13  ;;  %1837 = vmatpush.bf16.msra.mxu3 %v2240_v24  ;;  %v2236_v33 = vld [vmem:[%s2718_s1 + $0x10] sm:$0xff] }
 0x4b0   : > { %1623 = vrot.lane.b32.xlu2 %v1613_v36, %s2483_s21  ;;  %v1611_v38 = vsel %vm956_vm8, %v1610_v57, %v1593_v29  ;;  %v1606_v39 = vrot.slane %v1601_v56, 4  ;;  %v2235_v57 = vld [vmem:[%s2718_s1 + $0x8] sm:$0xff] }
 0x4b1   : > { %1619 = vrot.lane.b32.xlu1 %v1611_v38, %s2484_s24  ;;  %v1609_v59 = vsel %vm956_vm8, %v1601_v56, %v1608_v37  ;;  %v2234_v56 = vld [vmem:[%s2718_s1] sm:$0xff]  ;;  %p2212_p1 = scmp.ne.s32.totalorder %s3171_s26, 1 }
 0x4b2   : > { %1615 = vrot.lane.b32.xlu0 %v1609_v59, %s2485_s2  ;;  %v1607_v40 = vsel %vm956_vm8, %v1606_v39, %v1589_v34  ;;  %s3173_s7 = sld [smem:[#allocation24_spill]] (!%p2212_p1) }
 0x4b3   : > { %1838 = vmatpush.bf16.msra.mxu3 %v2239_v25  ;;  %s3174_s29 = sld [smem:[#allocation25_spill]] (!%p2212_p1) }
 0x4b4   : > { %s3175_s3 = sld [smem:[#allocation27_spill]] (!%p2212_p1) }
 0x4b7   : > { %1839 = vmatpush.bf16.msra.mxu3 %v2238_v27 }
 0x4bb   : > { %1840 = vmatpush.bf16.msra.mxu3 %v2237_v31 }
 0x4bf   : > { %1841 = vmatpush.bf16.msra.mxu3 %v2236_v33 }
 0x4c3   : > { %1842 = vmatpush.bf16.msra.mxu3 %v2235_v57 }
 0x4c7   : > { %1843 = vmatpush.bf16.msra.mxu3 %v2234_v56 }
 0x50a   : > { %v1624_v44 = vpop.permute.xlu2 %1623 }
 0x523   : > { %v1620_v42 = vpop.permute.xlu1 %1619 }
 0x524   : > { %v1616_v43 = vpop.permute.xlu0 %1615 }
 0x525   : > { %v1626_v62 = vsel %vm1302_vm9, %v1607_v40, %v1616_v43 }
 0x526   : > { %v1628_v46 = vsel %vm1627_vm12, %v1626_v62, %v1620_v42 }
 0x527   : > { %v1630_v47 = vsel %vm1629_vm13, %v1628_v46, %v1624_v44 }
 0x528   : > { %v1631_v48 = vpack.c.bf16 %v1630_v47, %v1630_v47 }
 0x52a   : > { %2170 = vmatmul.msk.bf16.vlgmr.msra.gmra.mxu1 %vm843_vm3, %v1631_v48 }
 0x5a7   : > { %v1664_v50 = vpop.f32.mrf.mxu1 }
 0x5a8   : > { %v1665_v51 = vadd.f32 %v2337_v49, %v1664_v50  ;;  %v2486_v50 = vmov -1.0  }
 0x5aa   : > { %v2990_v52 = vadd.f32 %v1665_v51, %v2731_v8 }
 0x5ac   : > { %v1671_v54 = vsel %vm843_vm3, %v2990_v52, 0.0  ;;  %v1675_v55 = vmul.f32 %v2990_v52, %v2990_v52 }
 0x5ad   : > { %1672 = vadd.xlane.f32.xlu0 %v1671_v54 }
 0x5ae   : > { %v1676_v45 = vsel %vm843_vm3, %v1675_v55, 0.0 }
 0x5af   : > { %v1666_v58 = vpop.f32.mrf.mxu1  ;;  %1677 = vadd.xlane.f32.xlu1 %v1676_v45 }
 0x620   : > { %v1673_v61 = vpop.xlane.xlu0 %1672 }
 0x621   : > { %v1674_v63 = vmul.f32 %v1673_v61, %v2739_v20  ;;  %v2341_v61 = vld [vmem:[%s800_s19] ss:$0 sm:$0xff]  ;;  %s3172_s19 = sld [smem:[#allocation26_spill]] (!%p2212_p1) }
 0x622   : > { %v1678_v1 = vpop.xlane.xlu1 %1677 }
 0x623   : > { %v1680_v8 = vmul.f32 %v1674_v63, %v1674_v63  ;;  %v1679_v2 = vmul.f32 %v1678_v1, %v2739_v20  ;;  %v1683_v14 = vsub.f32 %v2990_v52, %v1674_v63 }
 0x625   : > { %v1681_v3 = vsub.f32 %v1679_v2, %v1680_v8 }
 0x627   : > { %v1682_v4 = vmax.f32 %v1681_v3, 0.0 }
 0x629   : > { %v1684_v5 = vadd.f32 1e-05, %v1682_v4 }
 0x62b   : > { %2362 = vrsqrt.f32 %v1684_v5  ;;  %vm1691_vm15 = vweird.f32 %v1684_v5 }
 0x631   : > { %v2363_v6 = vpop.eup %2362 }
 0x632   : > { %v1686_v7 = vmul.f32 %v2363_v6, %v1684_v5  ;;  %vm1692_vm14 = vweird.f32 %v2363_v6 }
 0x633   : > { %vm1693_vm0 = vmor %vm1691_vm15, %vm1692_vm14 }
 0x634   : > { %v1687_v9 = vmul.f32 %v2363_v6, %v1686_v7 }
 0x636   : > { %v1688_v10 = vmul.f32 0.5, %v1687_v9 }
 0x638   : > { %v1689_v11 = vsub.f32 1.5, %v1688_v10 }
 0x63a   : > { %v1690_v12 = vmul.f32 %v2363_v6, %v1689_v11 }
 0x63c   : > { %v1694_v16 = vsel %vm1693_vm0, %v2363_v6, %v1690_v12 }
 0x63d   : > { %v1695_v17 = vmul.f32 %v1694_v16, %v1683_v14 }
 0x63f   : > { %v1699_v19 = vmul.f32 %v2338_v15, %v1695_v17 }
 0x641   : > { %v1703_v21 = vadd.f32 %v2339_v18, %v1699_v19 }
 0x643   : > { %v1704_v22 = vpack.c.bf16 %v1703_v21, %v1703_v21 }
 0x645   : > { %2179 = vmatmul.msk.bf16.vlgmr.msra.gmra.mxu2 %vm843_vm3, %v1704_v22 }
 0x6c8   : > { %v1737_v28 = vpop.f32.mrf.mxu2 }
 0x6c9   : > { %v1738_v29 = vadd.f32 %v2340_v26, %v1737_v28 }
 0x6cb   : > { %v1742_v30 = vmul.f32 0.70710677, %v1738_v29  ;;  %v1741_v55 = vmul.f32 0.5, %v1738_v29 }
 0x6cd   : > { %v1745_v32 = vand.u32 2147483647, %v1742_v30  ;;  %vm1743_vm1 = vcmp.ge.f32.partialorder %v1742_v30, 0.0 }
 0x6ce   : > { %v1744_v51 = vsel %vm1743_vm1, 1.0, %v2486_v50 }
 0x6cf   : > { %v1746_v53 = vmul.f32 0.3275911, %v1745_v32  ;;  %v1758_v37 = vsub.f32 0.0, %v1745_v32 }
 0x6d0   : > { %v1739_v34 = vpop.f32.mrf.mxu2 }
 0x6d1   : > { %v1747_v35 = vadd.f32 1.0, %v1746_v53  ;;  %v1759_v59 = vmul.f32 %v1758_v37, %v1745_v32 }
 0x6d3   : > { %2364 = vrcp.f32 %v1747_v35  ;;  %v1760_v13 = vmul.f32 1.442695, %v1759_v59 }
 0x6d5   : > { %2366 = vpow2.f32 %v1760_v13 }
 0x6d9   : > { %v2365_v36 = vpop.eup %2364 }
 0x6da   : > { %v1749_v38 = vmul.f32 1.0614054, %v2365_v36 }
 0x6db   : > { %v2367_v47 = vpop.eup %2366 }
 0x6dc   : > { %v1750_v39 = vadd.f32 -1.4531521, %v1749_v38 }
 0x6de   : > { %v1751_v40 = vmul.f32 %v2365_v36, %v1750_v39 }
 0x6e0   : > { %v1752_v41 = vadd.f32 1.4214138, %v1751_v40 }
 0x6e2   : > { %v1753_v42 = vmul.f32 %v2365_v36, %v1752_v41 }
 0x6e4   : > { %v1754_v43 = vadd.f32 -0.28449672, %v1753_v42 }
 0x6e6   : > { %v1755_v62 = vmul.f32 %v2365_v36, %v1754_v43 }
 0x6e8   : > { %v1756_v44 = vadd.f32 0.2548296, %v1755_v62 }
 0x6ea   : > { %v1757_v46 = vmul.f32 %v2365_v36, %v1756_v44 }
 0x6ec   : > { %v1762_v48 = vmul.f32 %v2367_v47, %v1757_v46 }
 0x6ee   : > { %v1763_v49 = vsub.f32 1.0, %v1762_v48 }
 0x6f0   : > { %v1764_v54 = vmul.f32 %v1763_v49, %v1744_v51 }
 0x6f2   : > { %v1765_v45 = vadd.f32 1.0, %v1764_v54 }
 0x6f4   : > { %v1766_v58 = vmul.f32 %v1765_v45, %v1741_v55 }
 0x6f6   : > { %v1767_v60 = vpack.c.bf16 %v1766_v58, %v1766_v58 }
 0x6f8   : > { %1844 = vmatmul.bf16.vlgmr.msra.gmra.mxu3 %v1767_v60 }
 0x77b   : > { %v1845_v63 = vpop.f32.mrf.mxu3 }
 0x77c   : > { %v1846_v0 = vadd.f32 %v2341_v61, %v1845_v63 }
 0x77e   : > { %v1849_v1 = vadd.f32 %v1846_v0, %v2990_v52 }
 0x77f   : > { %1854 = sbr.rel (%p2212_p1) target bundleno = 2222 (0x8ae), region = 104 }
 0x780   : > { %1850 = vst.msk [vmem:[#allocation2] sm:$0xff] %vm843_vm3, %v1849_v1 }
 0x783   : > { %v1847_v8 = vpop.f32.mrf.mxu3 }
 0x784   : > { %vm1857_vm2 = vcmask 261127   ;;  %v1862_v3 = vmul.f32 %v1849_v1, %v1849_v1  ;;  %v2243_v6 = vld [vmem:[%s3172_s19 + $0x8] sm:$0xff]  ;;  %v2242_v52 = vld [vmem:[%s3172_s19] sm:$0xff] }
 0x785   : > { %v1858_v2 = vsel %vm1857_vm2, %v1849_v1, 0.0  ;;  %1922 = vmatpush.bf16.msra.mxu0 %v2243_v6  ;;  %v2368_v24 = vld [vmem:[%s3173_s7] ss:$0 sm:$0xff] }
 0x786   : > { %1859 = vadd.xlane.f32.xlu0 %v1858_v2  ;;  %v1863_v4 = vsel %vm1857_vm2, %v1862_v3, 0.0  ;;  %v2369_v26 = vld [vmem:[%s3174_s29] ss:$0 sm:$0xff] }
 0x787   : > { %v1896_v32 = vld [vmem:[%s3175_s3] sm:$0x1] }
 0x789   : > { %1923 = vmatpush.bf16.msra.mxu0 %v2242_v52 }
 0x78e   : > { %1864 = vadd.xlane.f32.xlu0 %v1863_v4 }
 0x7f9   : > { %v1860_v5 = vpop.xlane.xlu0 %1859 }
 0x7fa   : > { %v1861_v7 = vmul.f32 %v1860_v5, %v2739_v20 }
 0x7fc   : > { %v1867_v10 = vmul.f32 %v1861_v7, %v1861_v7  ;;  %v1870_v23 = vsub.f32 %v1849_v1, %v1861_v7 }
 0x801   : > { %v1865_v9 = vpop.xlane.xlu0 %1864 }
 0x802   : > { %v1866_v11 = vmul.f32 %v1865_v9, %v2739_v20 }
 0x804   : > { %v1868_v12 = vsub.f32 %v1866_v11, %v1867_v10 }
 0x806   : > { %v1869_v14 = vmax.f32 %v1868_v12, 0.0 }
 0x808   : > { %v1871_v15 = vadd.f32 1e-05, %v1869_v14 }
 0x80a   : > { %2370 = vrsqrt.f32 %v1871_v15  ;;  %vm1878_vm5 = vweird.f32 %v1871_v15 }
 0x810   : > { %v2371_v16 = vpop.eup %2370 }
 0x811   : > { %v1873_v17 = vmul.f32 %v2371_v16, %v1871_v15  ;;  %vm1879_vm4 = vweird.f32 %v2371_v16 }
 0x812   : > { %vm1880_vm6 = vmor %vm1878_vm5, %vm1879_vm4 }
 0x813   : > { %v1874_v18 = vmul.f32 %v2371_v16, %v1873_v17 }
 0x815   : > { %v1875_v19 = vmul.f32 0.5, %v1874_v18 }
 0x817   : > { %v1876_v21 = vsub.f32 1.5, %v1875_v19 }
 0x819   : > { %v1877_v22 = vmul.f32 %v2371_v16, %v1876_v21 }
 0x81b   : > { %v1881_v20 = vsel %vm1880_vm6, %v2371_v16, %v1877_v22 }
 0x81c   : > { %v1882_v25 = vmul.f32 %v1881_v20, %v1870_v23 }
 0x81e   : > { %v1886_v27 = vmul.f32 %v2368_v24, %v1882_v25 }
 0x820   : > { %v1890_v28 = vadd.f32 %v2369_v26, %v1886_v27 }
 0x822   : > { %v1891_v29 = vpack.c.bf16 %v1890_v28, %v1890_v28 }
 0x824   : > { %v1898_v30 = vshrl.u32 %v1891_v29, 16 }
 0x826   : > { %v1900_v31 = vrot.slane %v1898_v30, 3 }
 0x828   : > { %2221 = vmatmul.msk.bf16.vlgmr.msra.gmra.mxu0 %vm843_vm3, %v1900_v31 }
 0x8a5   : > { %v1925_v53 = vpop.f32.mrf.mxu0 }
 0x8a6   : > { %v1926_v33 = vadd.f32 %v1925_v53, %v1896_v32 }
 0x8a8   : > { %1929 = vst [vmem:[%s2722_s16] sm:$0x1] %v1926_v33 }
 0x8ad   : > { %v1927_v34 = vpop.f32.mrf.mxu0 }
 0x8ae PF: > { %s3176_s27 = sld [smem:[#allocation9_spill]]  ;;  %s1941_s0 = sshll.u32 %s2722_s16, 4  ;;  %s1942_s0 = int_to_ptr.vmem [resolvable:$true] %s1941_s0 }
 0x8af   : > { %s3177_s1 = sld [smem:[#allocation28_spill]]  ;;  %s3180_s21 = sand.u32 1, %s2442_s30  }
 0x8b0   : > { %s1931_s24 = scalar_lea.sflag [#allocation4], %s3180_s21 }
 0x8b5   : > { %s3178_s26 = smov %s3177_s1  ;;  %s1939_s5 = scalar_lea.hbm %s3177_s1, %s3176_s27 }
 0x8b6   : > { %s1943_s18 = sshll.u32 %s1939_s5, 4  ;;  %s2392_s29 = scalar_lea.hbm %s3178_s26, 2  ;;  %s1944_s18 = int_to_ptr.hbm [resolvable:$true] %s1943_s18 }
 0x8b7   : > { %s2386_s2 = sshra.s32 %s1944_s18, 4  ;;  %s2387_s2 = int_to_ptr.hbm [resolvable:$true] %s2386_s2 }
 0x8b8   : > { %s2388_s7 = scalar_lea.hbm %s2387_s2, 1  ;;  %p2393_p6 = scmp.lt.s32.totalorder %s2387_s2, %s3178_s26 }
 0x8b9   : > { %p2389_p2 = scmp.ne.s32.totalorder %s2387_s2, %s2388_s7  ;;  %p2394_p7 = scmp.lt.s32.totalorder %s2392_s29, %s2388_s7 }
 0x8bb   : > { %p2390_p4 = pnand %p2389_p2, %p2636_p3  ;;  %p2395_p8 = por %p2394_p7, %p2393_p6 }
 0x8bd   : > { %p2391_p5 = pneg %p2390_p4 }
 0x8bf   : > { %p2396_p10 = pnand %p2395_p8, %p2391_p5 }
 0x8c1   : > { %2399 = shalt.err (!%p2396_p10)
}
 0x8c2   : > { %2244 = dma.vmem_to_hbm [thread:$0]  (%p2636_p3), %s1942_s0, 16, %s1944_s18, %s1931_s24  }
 0x8c3 PF: > { %s3181_s16 = sld [smem:[#allocation12_spill]] }
 0x8c4   : > { %s3182_s3 = sld [smem:[#allocation6_spill]] }
 0x8c9   : > { %p2250_p11 = scmp.ge.s32.totalorder %s3181_s16, 2 }
 0x8ca   : > { %s1955_s28 = sand.u32 1, %s3182_s3  }
 0x8cb   : > { %p2247_p12 = pnand %p2250_p11, %p2646_p9  ;;  %s1956_s15 = scalar_lea.sflag [#allocation4], %s1955_s28 }
 0x8cd   : > { %p2248_p13 = pneg %p2247_p12 }
 0x8cf   : > { %2433 = dma.done.wait (%p2248_p13), %s1956_s15, 16  }
 0x8d0   : > { %2435 = vsyncadd (%p2248_p13), %s1956_s15, 4294967280  ;;  %s32_s23 = sadd.s32 1, %s3181_s16   ;;  %s3184_s1 = sld [smem:[#allocation7_spill]] }
 0x8d1   : > { %p29_p0 = scmp.ge.s32.totalorder %s32_s23, 6   ;;  %s3185_s20 = sld [smem:[#allocation17_spill]] }
 0x8d2   : > { %s3186_s21 = sld [smem:[#allocation10_spill]]  ;;  %s3190_s0 = smov %s2442_s30 }
 0x8d3   : > { %s3187_s5 = sld [smem:[#allocation11_spill]] }
 0x8d4   : > { %s3188_s22 = sld [smem:[#allocation13_spill]] }
 0x8d5   : > { %s3189_s2 = sld [smem:[#allocation15_spill]]  ;;  %31 = sbr.rel (!%p29_p0) target bundleno = 17 (0x11), region = 175 }
 0x8d6   : > { %s3191_s30 = smov %s3184_s1 }
 0x8d9   : > { %s3192_s1 = smov %s3187_s5 }
 0x8da   :  { %1961 = vsyncpa [#allocation4], 1 }
 0x8db   :  { %1963 = vsyncpa [#allocation4 + $0x1], 1 }

</bundles_post_ra>
